<compile_context>
chip_gen: v7x
topology: tpu7x:2x2x1
jax: 0.10.0
libtpu: 0.0.40
codegen_flags: <defaults>
</compile_context>

<pallas_src>
import functools

import jax
import jax.numpy as jnp
from jax.experimental import pallas as pl
from jax.experimental.pallas import tpu as pltpu


def _stats_select_kernel(*refs, n_branches, n_heads, eps, combine_f32):
    x_refs = refs[:n_branches]
    w1_ref, b1_ref, w2_ref, b2_ref, o_ref = refs[n_branches:]

    # ---- branch sum (f32 accumulate), native (TB, C, T) layout ----
    xs = x_refs[0][...].astype(jnp.float32)
    for r in x_refs[1:]:
        xs = xs + r[...].astype(jnp.float32)
    TB, C, T = xs.shape

    # ---- high-order statistics pooling over time (unbiased std) ----
    # Reduce raw central moments; scale the small (TB, C) sums afterwards so we
    # never materialize `norm` as a (TB, C, T) tensor.
    inv_t = 1.0 / T
    mean = jnp.sum(xs, axis=-1) * inv_t                       # (TB, C)
    diff = xs - mean[:, :, None]                              # (TB, C, T)
    d2 = diff * diff                                          # (TB, C, T)
    s2 = jnp.sum(d2, axis=-1)                                 # (TB, C)
    s3 = jnp.sum(d2 * diff, axis=-1)                          # (TB, C)
    s4 = jnp.sum(d2 * d2, axis=-1)                            # (TB, C)
    std = jnp.sqrt(s2 * (1.0 / (T - 1)))                      # (TB, C)
    inv_denom = 1.0 / jnp.maximum(std, eps)                   # exact, small vector
    inv2 = inv_denom * inv_denom
    skew = s3 * (inv2 * inv_denom) * inv_t                    # (TB, C)
    kurt = s4 * (inv2 * inv2) * inv_t                         # (TB, C)

    # ---- linear1 as four lane-aligned (TB,C)@(C,H) dots (no 4C concat) ----
    h = b1_ref[...].astype(jnp.float32)                       # (1, H) -> bcast
    for i, v in enumerate((mean, std, skew, kurt)):
        h = h + jnp.dot(v, w1_ref[i], preferred_element_type=jnp.float32)
    # h: (TB, H)

    # ---- linear2: one (TB,H)@(H,C) dot per head (lane-aligned logits) ----
    rows = []
    for n in range(n_heads):
        rows.append(jnp.dot(h, w2_ref[n], preferred_element_type=jnp.float32)
                    + b2_ref[n].astype(jnp.float32))          # (TB, C)

    # ---- softmax over the head axis (small per-head (TB, C) slices) ----
    m = rows[0]
    for r in rows[1:]:
        m = jnp.maximum(m, r)
    es = [jnp.exp(r - m) for r in rows]
    tot = es[0]
    for e in es[1:]:
        tot = tot + e
    inv_tot = 1.0 / tot                                       # (TB, C)

    # ---- weighted branch sum (drops the null head automatically) ----
    out = None
    for n in range(n_branches):
        scale = es[n] * inv_tot                               # (TB, C) f32
        xv = x_refs[n][...]
        if combine_f32:
            term = xv.astype(jnp.float32) * scale[:, :, None]
        else:
            # bf16 multiply (native VALU on v6e/v7x), f32 accumulation.
            term = (xv * scale[:, :, None].astype(xv.dtype)).astype(jnp.float32)
        out = term if out is None else out + term
    o_ref[...] = out.astype(o_ref.dtype)


def _vmem_capacity_bytes():
    try:
        return int(pltpu.get_tpu_info().vmem_capacity_bytes)
    except Exception:
        return 64 << 20                     # conservative (v7x per-TC VMEM)


def _pick_batch_tile(B, per_sample_bytes, budget_bytes):
    """Largest divisor of B fitting the VMEM budget, preferring an even grid-step
    count (>=2) for dual-TensorCore chips, then >=2 steps, then anything."""
    divisors = [d for d in range(1, B + 1) if B % d == 0]
    fitting = [d for d in divisors if d * per_sample_bytes <= budget_bytes] or [1]
    even = [d for d in fitting if (B // d) >= 2 and (B // d) % 2 == 0]
    if even:
        return max(even)
    multi = [d for d in fitting if (B // d) >= 2]
    if multi:
        return max(multi)
    return max(fitting)


def stats_select(branch_inputs, params, *, null=False, eps=0.01,
                 out_dtype=None, batch_tile=None):
    """branch_inputs: list of (B, C, T) arrays (same shape/dtype). Returns (B, C, T)."""
    br = len(branch_inputs)
    B, C, T = branch_inputs[0].shape
    in_dtype = branch_inputs[0].dtype
    out_dtype = out_dtype or in_dtype

    # Weights stay in their native (model) dtype; f32 comes from the dots'
    # preferred_element_type (halves weight HBM/VMEM when the model is bf16).
    w1 = params["w1"].reshape(4, C, -1)                 # (4, C, H)  (was (4C, H))
    H = w1.shape[-1]
    b1 = params["b1"].reshape(1, H)                     # (1, H)
    w2 = params["w2"]                                   # (n_heads, H, C)
    b2 = params["b2"].reshape(-1, 1, C)                 # (n_heads, 1, C)
    n_heads = w2.shape[0]
    assert n_heads == br + (1 if null else 0)

    in_bytes = jnp.dtype(in_dtype).itemsize
    out_bytes = jnp.dtype(out_dtype).itemsize
    weight_bytes = sum(int(a.size) * jnp.dtype(a.dtype).itemsize
                       for a in (w1, b1, w2, b2))

    # Per-batch-row VMEM cost: double-buffered I/O blocks + f32 intermediates
    # (xs, diff, d2, product temp, out accumulator, slack).
    per_sample_bytes = ((br * in_bytes + out_bytes) * C * T * 2
                        + 6 * C * T * 4)

    # Generation-aware budget / limit (v5e/v6e: 128 MiB VMEM; v7x: 64 MiB/TC).
    vmem_cap = _vmem_capacity_bytes()
    if vmem_cap >= (96 << 20):
        tile_budget, vmem_ceiling = 96 << 20, 112 << 20
    else:
        tile_budget, vmem_ceiling = 36 << 20, 52 << 20
    tile_budget = max(tile_budget - 2 * weight_bytes, 4 << 20)

    TB = batch_tile if batch_tile is not None else _pick_batch_tile(
        B, per_sample_bytes, tile_budget)
    assert B % TB == 0, (B, TB)
    grid = (B // TB,)

    vmem_limit = int(min(max(per_sample_bytes * TB + 2 * weight_bytes + (4 << 20),
                             16 << 20),
                         vmem_ceiling))

    kernel = functools.partial(
        _stats_select_kernel, n_branches=br, n_heads=n_heads, eps=float(eps),
        combine_f32=(jnp.dtype(in_dtype).itemsize >= 4))

    in_specs = (
        [pl.BlockSpec((TB, C, T), lambda b: (b, 0, 0)) for _ in range(br)]
        + [pl.BlockSpec((4, C, H), lambda b: (0, 0, 0)),           # W1 blocks
           pl.BlockSpec((1, H), lambda b: (0, 0)),                 # b1
           pl.BlockSpec((n_heads, H, C), lambda b: (0, 0, 0)),     # W2 heads
           pl.BlockSpec((n_heads, 1, C), lambda b: (0, 0, 0))])    # b2 heads

    return pl.pallas_call(
        kernel,
        out_shape=jax.ShapeDtypeStruct((B, C, T), out_dtype),
        grid_spec=pltpu.PrefetchScalarGridSpec(
            num_scalar_prefetch=0,
            grid=grid,
            in_specs=in_specs,
            out_specs=pl.BlockSpec((TB, C, T), lambda b: (b, 0, 0)),
        ),
        compiler_params=pltpu.CompilerParams(
            dimension_semantics=("parallel",),
            vmem_limit_bytes=vmem_limit),
    )(*branch_inputs, w1, b1, w2, b2)


def init_params(key, channels, branches, *, null=False, reduction=1):
    """Deterministic synthetic init matching nn.Linear shapes (stored transposed)."""
    n_heads = branches + (1 if null else 0)
    H = channels // reduction
    k1, k2, k3, k4 = jax.random.split(key, 4)
    return {
        # linear1.weight is (H, 4C) in torch; store as (4C, H) for x @ W
        "w1": 0.1 * jax.random.normal(k1, (4 * channels, H), jnp.float32),
        "b1": 0.1 * jax.random.normal(k2, (1, H), jnp.float32),
        # linear2[i].weight is (C, H); stack stored as (n_heads, H, C)
        "w2": 0.1 * jax.random.normal(k3, (n_heads, H, channels), jnp.float32),
        "b2": 0.1 * jax.random.normal(k4, (n_heads, channels), jnp.float32),
    }


def stats_select_ref(branch_inputs, params, *, null=False, eps=0.01):
    """Pure-JAX reference replicating the PyTorch forward exactly."""
    f = jnp.stack(branch_inputs, axis=1).astype(jnp.float32)   # (B, br, C, T)
    x = jnp.sum(f, axis=1)                                     # (B, C, T)
    T = x.shape[-1]
    mean = jnp.mean(x, axis=-1)                                # (B, C)
    std = jnp.sqrt(jnp.sum((x - mean[..., None]) ** 2, axis=-1) / (T - 1))
    norm = (x - mean[..., None]) / jnp.maximum(std, eps)[..., None]
    skew = jnp.mean(norm ** 3, axis=-1)
    kurt = jnp.mean(norm ** 4, axis=-1)
    stats = jnp.concatenate([mean, std, skew, kurt], axis=-1)  # (B, 4C)
    h = stats @ params["w1"] + params["b1"]                    # (B, H)
    logits = jnp.einsum("bh,nhc->bnc", h, params["w2"]) + params["b2"][None]
    s = jax.nn.softmax(logits, axis=1)                         # (B, n_heads, C)
    s = s[:, :f.shape[1]]                                      # drop null branch
    return jnp.sum(f * s[..., None], axis=1)                   # (B, C, T)


if __name__ == "__main__":
    B, C, T = 8, 16, 128
    branches = 3
    reduction = 1

    key = jax.random.PRNGKey(0)
    for null in (False, True):
        kcfg = jax.random.fold_in(key, int(null))
        kp, kx = jax.random.split(kcfg)
        params = init_params(kp, C, branches, null=null, reduction=reduction)
        xkeys = jax.random.split(kx, branches)
        branch_inputs = [jax.random.normal(k, (B, C, T), jnp.float32) for k in xkeys]

        out = jax.block_until_ready(stats_select(branch_inputs, params, null=null))
        ref = stats_select_ref(branch_inputs, params, null=null)
        assert out.shape == (B, C, T)
        assert out.dtype == branch_inputs[0].dtype
        max_err = float(jnp.max(jnp.abs(out - ref)))
        assert jnp.allclose(out, ref, atol=1e-4, rtol=1e-4), max_err

    print("KERNEL_OK")
</pallas_src>

<mosaic_0001>
module attributes {stable_mosaic.version = 11 : i64} {
  func.func @_stats_select_kernel(%arg0: i32, %arg1: memref<4x16x128xf32, #tpu.memory_space<vmem>>, %arg2: memref<4x16x128xf32, #tpu.memory_space<vmem>>, %arg3: memref<4x16x128xf32, #tpu.memory_space<vmem>>, %arg4: memref<4x16x16xf32, #tpu.memory_space<vmem>>, %arg5: memref<1x16xf32, #tpu.memory_space<vmem>>, %arg6: memref<3x16x16xf32, #tpu.memory_space<vmem>>, %arg7: memref<3x1x16xf32, #tpu.memory_space<vmem>>, %arg8: memref<4x16x128xf32, #tpu.memory_space<vmem>>) attributes {dimension_semantics = [#tpu.dimension_semantics<parallel>], iteration_bounds = array<i64: 2>, scalar_prefetch = 0 : i64, scratch_operands = 0 : i64, tpu.core_type = #tpu.core_type<tc>, window_params = [{transform_indices = @transform_0, window_bounds = array<i64: 4, 16, 128>}, {transform_indices = @transform_1, window_bounds = array<i64: 4, 16, 128>}, {transform_indices = @transform_2, window_bounds = array<i64: 4, 16, 128>}, {pipeline_mode = #tpu.pipeline_mode<synchronous>, transform_indices = @transform_3, window_bounds = array<i64: 4, 16, 16>}, {pipeline_mode = #tpu.pipeline_mode<synchronous>, transform_indices = @transform_4, window_bounds = array<i64: 1, 16>}, {pipeline_mode = #tpu.pipeline_mode<synchronous>, transform_indices = @transform_5, window_bounds = array<i64: 3, 16, 16>}, {pipeline_mode = #tpu.pipeline_mode<synchronous>, transform_indices = @transform_6, window_bounds = array<i64: 3, 1, 16>}, {transform_indices = @transform_7, window_bounds = array<i64: 4, 16, 128>}]} {
    %c0 = arith.constant 0 : index
    %c0_0 = arith.constant 0 : index
    %c0_1 = arith.constant 0 : index
    %0 = vector.load %arg1[%c0, %c0_0, %c0_1] : memref<4x16x128xf32, #tpu.memory_space<vmem>>, vector<4x16x128xf32>
    %c0_2 = arith.constant 0 : index
    %c0_3 = arith.constant 0 : index
    %c0_4 = arith.constant 0 : index
    %1 = vector.load %arg2[%c0_2, %c0_3, %c0_4] : memref<4x16x128xf32, #tpu.memory_space<vmem>>, vector<4x16x128xf32>
    %2 = arith.addf %0, %1 : vector<4x16x128xf32>
    %c0_5 = arith.constant 0 : index
    %c0_6 = arith.constant 0 : index
    %c0_7 = arith.constant 0 : index
    %3 = vector.load %arg3[%c0_5, %c0_6, %c0_7] : memref<4x16x128xf32, #tpu.memory_space<vmem>>, vector<4x16x128xf32>
    %4 = arith.addf %2, %3 : vector<4x16x128xf32>
    %cst = arith.constant dense<0.000000e+00> : vector<4x16xf32>
    %5 = vector.multi_reduction <add>, %4, %cst [2] : vector<4x16x128xf32> to vector<4x16xf32>
    %cst_8 = arith.constant 7.812500e-03 : f32
    %6 = vector.broadcast %cst_8 : f32 to vector<4x16xf32>
    %7 = arith.mulf %5, %6 : vector<4x16xf32>
    %8 = vector.shape_cast %7 : vector<4x16xf32> to vector<4x16x1xf32>
    %9 = vector.broadcast %8 : vector<4x16x1xf32> to vector<4x16x128xf32>
    %10 = arith.subf %4, %9 : vector<4x16x128xf32>
    %11 = arith.mulf %10, %10 : vector<4x16x128xf32>
    %cst_9 = arith.constant dense<0.000000e+00> : vector<4x16xf32>
    %12 = vector.multi_reduction <add>, %11, %cst_9 [2] : vector<4x16x128xf32> to vector<4x16xf32>
    %13 = arith.mulf %11, %10 : vector<4x16x128xf32>
    %cst_10 = arith.constant dense<0.000000e+00> : vector<4x16xf32>
    %14 = vector.multi_reduction <add>, %13, %cst_10 [2] : vector<4x16x128xf32> to vector<4x16xf32>
    %15 = arith.mulf %11, %11 : vector<4x16x128xf32>
    %cst_11 = arith.constant dense<0.000000e+00> : vector<4x16xf32>
    %16 = vector.multi_reduction <add>, %15, %cst_11 [2] : vector<4x16x128xf32> to vector<4x16xf32>
    %cst_12 = arith.constant 0.00787401571 : f32
    %17 = vector.broadcast %cst_12 : f32 to vector<4x16xf32>
    %18 = arith.mulf %12, %17 : vector<4x16xf32>
    %19 = math.sqrt %18 : vector<4x16xf32>
    %cst_13 = arith.constant 0.00999999977 : f32
    %20 = vector.broadcast %cst_13 : f32 to vector<4x16xf32>
    %21 = arith.maximumf %19, %20 : vector<4x16xf32>
    %cst_14 = arith.constant 1.000000e+00 : f32
    %22 = vector.broadcast %cst_14 : f32 to vector<4x16xf32>
    %23 = arith.divf %22, %21 : vector<4x16xf32>
    %24 = arith.mulf %23, %23 : vector<4x16xf32>
    %25 = arith.mulf %24, %23 : vector<4x16xf32>
    %26 = arith.mulf %14, %25 : vector<4x16xf32>
    %cst_15 = arith.constant 7.812500e-03 : f32
    %27 = vector.broadcast %cst_15 : f32 to vector<4x16xf32>
    %28 = arith.mulf %26, %27 : vector<4x16xf32>
    %29 = arith.mulf %24, %24 : vector<4x16xf32>
    %30 = arith.mulf %16, %29 : vector<4x16xf32>
    %cst_16 = arith.constant 7.812500e-03 : f32
    %31 = vector.broadcast %cst_16 : f32 to vector<4x16xf32>
    %32 = arith.mulf %30, %31 : vector<4x16xf32>
    %c0_17 = arith.constant 0 : index
    %c0_18 = arith.constant 0 : index
    %33 = vector.load %arg5[%c0_17, %c0_18] : memref<1x16xf32, #tpu.memory_space<vmem>>, vector<1x16xf32>
    %c0_19 = arith.constant 0 : index
    %c0_20 = arith.constant 0 : index
    %c0_21 = arith.constant 0 : index
    %34 = vector.load %arg4[%c0_19, %c0_20, %c0_21] : memref<4x16x16xf32, #tpu.memory_space<vmem>>, vector<1x16x16xf32>
    %35 = vector.shape_cast %34 : vector<1x16x16xf32> to vector<16x16xf32>
    %cst_22 = arith.constant dense<0.000000e+00> : vector<4x16xf32>
    %36 = tpu.matmul %7, %35, %cst_22 {dimension_numbers = #tpu.dot_dimension_numbers<[1], [0], [0], [1], [0, 0, 1, 1], [], []>} : vector<4x16xf32>, vector<16x16xf32>, vector<4x16xf32> -> vector<4x16xf32>
    %37 = vector.broadcast %33 : vector<1x16xf32> to vector<4x16xf32>
    %38 = arith.addf %37, %36 : vector<4x16xf32>
    %c1 = arith.constant 1 : index
    %c0_23 = arith.constant 0 : index
    %c0_24 = arith.constant 0 : index
    %39 = vector.load %arg4[%c1, %c0_23, %c0_24] : memref<4x16x16xf32, #tpu.memory_space<vmem>>, vector<1x16x16xf32>
    %40 = vector.shape_cast %39 : vector<1x16x16xf32> to vector<16x16xf32>
    %cst_25 = arith.constant dense<0.000000e+00> : vector<4x16xf32>
    %41 = tpu.matmul %19, %40, %cst_25 {dimension_numbers = #tpu.dot_dimension_numbers<[1], [0], [0], [1], [0, 0, 1, 1], [], []>} : vector<4x16xf32>, vector<16x16xf32>, vector<4x16xf32> -> vector<4x16xf32>
    %42 = arith.addf %38, %41 : vector<4x16xf32>
    %c2 = arith.constant 2 : index
    %c0_26 = arith.constant 0 : index
    %c0_27 = arith.constant 0 : index
    %43 = vector.load %arg4[%c2, %c0_26, %c0_27] : memref<4x16x16xf32, #tpu.memory_space<vmem>>, vector<1x16x16xf32>
    %44 = vector.shape_cast %43 : vector<1x16x16xf32> to vector<16x16xf32>
    %cst_28 = arith.constant dense<0.000000e+00> : vector<4x16xf32>
    %45 = tpu.matmul %28, %44, %cst_28 {dimension_numbers = #tpu.dot_dimension_numbers<[1], [0], [0], [1], [0, 0, 1, 1], [], []>} : vector<4x16xf32>, vector<16x16xf32>, vector<4x16xf32> -> vector<4x16xf32>
    %46 = arith.addf %42, %45 : vector<4x16xf32>
    %c3 = arith.constant 3 : index
    %c0_29 = arith.constant 0 : index
    %c0_30 = arith.constant 0 : index
    %47 = vector.load %arg4[%c3, %c0_29, %c0_30] : memref<4x16x16xf32, #tpu.memory_space<vmem>>, vector<1x16x16xf32>
    %48 = vector.shape_cast %47 : vector<1x16x16xf32> to vector<16x16xf32>
    %cst_31 = arith.constant dense<0.000000e+00> : vector<4x16xf32>
    %49 = tpu.matmul %32, %48, %cst_31 {dimension_numbers = #tpu.dot_dimension_numbers<[1], [0], [0], [1], [0, 0, 1, 1], [], []>} : vector<4x16xf32>, vector<16x16xf32>, vector<4x16xf32> -> vector<4x16xf32>
    %50 = arith.addf %46, %49 : vector<4x16xf32>
    %c0_32 = arith.constant 0 : index
    %c0_33 = arith.constant 0 : index
    %c0_34 = arith.constant 0 : index
    %51 = vector.load %arg6[%c0_32, %c0_33, %c0_34] : memref<3x16x16xf32, #tpu.memory_space<vmem>>, vector<1x16x16xf32>
    %52 = vector.shape_cast %51 : vector<1x16x16xf32> to vector<16x16xf32>
    %cst_35 = arith.constant dense<0.000000e+00> : vector<4x16xf32>
    %53 = tpu.matmul %50, %52, %cst_35 {dimension_numbers = #tpu.dot_dimension_numbers<[1], [0], [0], [1], [0, 0, 1, 1], [], []>} : vector<4x16xf32>, vector<16x16xf32>, vector<4x16xf32> -> vector<4x16xf32>
    %c0_36 = arith.constant 0 : index
    %c0_37 = arith.constant 0 : index
    %c0_38 = arith.constant 0 : index
    %54 = vector.load %arg7[%c0_36, %c0_37, %c0_38] : memref<3x1x16xf32, #tpu.memory_space<vmem>>, vector<1x1x16xf32>
    %55 = vector.shape_cast %54 : vector<1x1x16xf32> to vector<1x16xf32>
    %56 = vector.broadcast %55 : vector<1x16xf32> to vector<4x16xf32>
    %57 = arith.addf %53, %56 : vector<4x16xf32>
    %c1_39 = arith.constant 1 : index
    %c0_40 = arith.constant 0 : index
    %c0_41 = arith.constant 0 : index
    %58 = vector.load %arg6[%c1_39, %c0_40, %c0_41] : memref<3x16x16xf32, #tpu.memory_space<vmem>>, vector<1x16x16xf32>
    %59 = vector.shape_cast %58 : vector<1x16x16xf32> to vector<16x16xf32>
    %cst_42 = arith.constant dense<0.000000e+00> : vector<4x16xf32>
    %60 = tpu.matmul %50, %59, %cst_42 {dimension_numbers = #tpu.dot_dimension_numbers<[1], [0], [0], [1], [0, 0, 1, 1], [], []>} : vector<4x16xf32>, vector<16x16xf32>, vector<4x16xf32> -> vector<4x16xf32>
    %c1_43 = arith.constant 1 : index
    %c0_44 = arith.constant 0 : index
    %c0_45 = arith.constant 0 : index
    %61 = vector.load %arg7[%c1_43, %c0_44, %c0_45] : memref<3x1x16xf32, #tpu.memory_space<vmem>>, vector<1x1x16xf32>
    %62 = vector.shape_cast %61 : vector<1x1x16xf32> to vector<1x16xf32>
    %63 = vector.broadcast %62 : vector<1x16xf32> to vector<4x16xf32>
    %64 = arith.addf %60, %63 : vector<4x16xf32>
    %c2_46 = arith.constant 2 : index
    %c0_47 = arith.constant 0 : index
    %c0_48 = arith.constant 0 : index
    %65 = vector.load %arg6[%c2_46, %c0_47, %c0_48] : memref<3x16x16xf32, #tpu.memory_space<vmem>>, vector<1x16x16xf32>
    %66 = vector.shape_cast %65 : vector<1x16x16xf32> to vector<16x16xf32>
    %cst_49 = arith.constant dense<0.000000e+00> : vector<4x16xf32>
    %67 = tpu.matmul %50, %66, %cst_49 {dimension_numbers = #tpu.dot_dimension_numbers<[1], [0], [0], [1], [0, 0, 1, 1], [], []>} : vector<4x16xf32>, vector<16x16xf32>, vector<4x16xf32> -> vector<4x16xf32>
    %c2_50 = arith.constant 2 : index
    %c0_51 = arith.constant 0 : index
    %c0_52 = arith.constant 0 : index
    %68 = vector.load %arg7[%c2_50, %c0_51, %c0_52] : memref<3x1x16xf32, #tpu.memory_space<vmem>>, vector<1x1x16xf32>
    %69 = vector.shape_cast %68 : vector<1x1x16xf32> to vector<1x16xf32>
    %70 = vector.broadcast %69 : vector<1x16xf32> to vector<4x16xf32>
    %71 = arith.addf %67, %70 : vector<4x16xf32>
    %72 = arith.maximumf %57, %64 : vector<4x16xf32>
    %73 = arith.maximumf %72, %71 : vector<4x16xf32>
    %74 = arith.subf %57, %73 : vector<4x16xf32>
    %75 = math.exp %74 : vector<4x16xf32>
    %76 = arith.subf %64, %73 : vector<4x16xf32>
    %77 = math.exp %76 : vector<4x16xf32>
    %78 = arith.subf %71, %73 : vector<4x16xf32>
    %79 = math.exp %78 : vector<4x16xf32>
    %80 = arith.addf %75, %77 : vector<4x16xf32>
    %81 = arith.addf %80, %79 : vector<4x16xf32>
    %cst_53 = arith.constant 1.000000e+00 : f32
    %82 = vector.broadcast %cst_53 : f32 to vector<4x16xf32>
    %83 = arith.divf %82, %81 : vector<4x16xf32>
    %84 = arith.mulf %75, %83 : vector<4x16xf32>
    %c0_54 = arith.constant 0 : index
    %c0_55 = arith.constant 0 : index
    %c0_56 = arith.constant 0 : index
    %85 = vector.load %arg1[%c0_54, %c0_55, %c0_56] : memref<4x16x128xf32, #tpu.memory_space<vmem>>, vector<4x16x128xf32>
    %86 = vector.shape_cast %84 : vector<4x16xf32> to vector<4x16x1xf32>
    %87 = vector.broadcast %86 : vector<4x16x1xf32> to vector<4x16x128xf32>
    %88 = arith.mulf %85, %87 : vector<4x16x128xf32>
    %89 = arith.mulf %77, %83 : vector<4x16xf32>
    %c0_57 = arith.constant 0 : index
    %c0_58 = arith.constant 0 : index
    %c0_59 = arith.constant 0 : index
    %90 = vector.load %arg2[%c0_57, %c0_58, %c0_59] : memref<4x16x128xf32, #tpu.memory_space<vmem>>, vector<4x16x128xf32>
    %91 = vector.shape_cast %89 : vector<4x16xf32> to vector<4x16x1xf32>
    %92 = vector.broadcast %91 : vector<4x16x1xf32> to vector<4x16x128xf32>
    %93 = arith.mulf %90, %92 : vector<4x16x128xf32>
    %94 = arith.addf %88, %93 : vector<4x16x128xf32>
    %95 = arith.mulf %79, %83 : vector<4x16xf32>
    %c0_60 = arith.constant 0 : index
    %c0_61 = arith.constant 0 : index
    %c0_62 = arith.constant 0 : index
    %96 = vector.load %arg3[%c0_60, %c0_61, %c0_62] : memref<4x16x128xf32, #tpu.memory_space<vmem>>, vector<4x16x128xf32>
    %97 = vector.shape_cast %95 : vector<4x16xf32> to vector<4x16x1xf32>
    %98 = vector.broadcast %97 : vector<4x16x1xf32> to vector<4x16x128xf32>
    %99 = arith.mulf %96, %98 : vector<4x16x128xf32>
    %100 = arith.addf %94, %99 : vector<4x16x128xf32>
    %c0_63 = arith.constant 0 : index
    %c0_64 = arith.constant 0 : index
    %c0_65 = arith.constant 0 : index
    %101 = vector.load %arg8[%c0_63, %c0_64, %c0_65] : memref<4x16x128xf32, #tpu.memory_space<vmem>>, vector<4x16x128xf32>
    tpu.vector_store %arg8[%c0_63, %c0_64, %c0_65], %100 {strides = array<i32>} : memref<4x16x128xf32, #tpu.memory_space<vmem>>, vector<4x16x128xf32>,
    return
  }
  func.func @transform_0(%arg0: i32) -> (i32, i32, i32) {
    %c0_i32 = arith.constant 0 : i32
    %c0_i32_0 = arith.constant 0 : i32
    %c0_i32_1 = arith.constant 0 : i32
    return %arg0, %c0_i32, %c0_i32_0 : i32, i32, i32
  }
  func.func @transform_1(%arg0: i32) -> (i32, i32, i32) {
    %c0_i32 = arith.constant 0 : i32
    %c0_i32_0 = arith.constant 0 : i32
    %c0_i32_1 = arith.constant 0 : i32
    return %arg0, %c0_i32, %c0_i32_0 : i32, i32, i32
  }
  func.func @transform_2(%arg0: i32) -> (i32, i32, i32) {
    %c0_i32 = arith.constant 0 : i32
    %c0_i32_0 = arith.constant 0 : i32
    %c0_i32_1 = arith.constant 0 : i32
    return %arg0, %c0_i32, %c0_i32_0 : i32, i32, i32
  }
  func.func @transform_3(%arg0: i32) -> (i32, i32, i32) {
    %c0_i32 = arith.constant 0 : i32
    %c0_i32_0 = arith.constant 0 : i32
    %c0_i32_1 = arith.constant 0 : i32
    %c0_i32_2 = arith.constant 0 : i32
    return %c0_i32, %c0_i32_0, %c0_i32_1 : i32, i32, i32
  }
  func.func @transform_4(%arg0: i32) -> (i32, i32) {
    %c0_i32 = arith.constant 0 : i32
    %c0_i32_0 = arith.constant 0 : i32
    %c0_i32_1 = arith.constant 0 : i32
    return %c0_i32, %c0_i32_0 : i32, i32
  }
  func.func @transform_5(%arg0: i32) -> (i32, i32, i32) {
    %c0_i32 = arith.constant 0 : i32
    %c0_i32_0 = arith.constant 0 : i32
    %c0_i32_1 = arith.constant 0 : i32
    %c0_i32_2 = arith.constant 0 : i32
    return %c0_i32, %c0_i32_0, %c0_i32_1 : i32, i32, i32
  }
  func.func @transform_6(%arg0: i32) -> (i32, i32, i32) {
    %c0_i32 = arith.constant 0 : i32
    %c0_i32_0 = arith.constant 0 : i32
    %c0_i32_1 = arith.constant 0 : i32
    %c0_i32_2 = arith.constant 0 : i32
    return %c0_i32, %c0_i32_0, %c0_i32_1 : i32, i32, i32
  }
  func.func @transform_7(%arg0: i32) -> (i32, i32, i32) {
    %c0_i32 = arith.constant 0 : i32
    %c0_i32_0 = arith.constant 0 : i32
    %c0_i32_1 = arith.constant 0 : i32
    return %arg0, %c0_i32, %c0_i32_0 : i32, i32, i32
  }
}

</mosaic_0001>

<bundles_post_ra>
// kernel: tpu_custom_call.1
= control target key start
LH: loop header
LB: loop body
LE: loop exit
PB: predicated region body
PF: predicated region fallthrough
CT: control target
= control target key end

     0   :  { %s3005_s0 = inlined_call_operand.hbm [shape: f32[8,16,128], index: 0, kind: input, shape index: {}]   ;;  %s3006_s1 = inlined_call_operand.hbm [shape: f32[8,16,128], index: 1, kind: input, shape index: {}]   ;;  %s3007_s2 = inlined_call_operand.hbm [shape: f32[8,16,128], index: 2, kind: input, shape index: {}]   ;;  %s3008_s3 = inlined_call_operand.hbm [shape: f32[4,16,16], index: 3, kind: input, shape index: {}]   ;;  %s3009_s4 = inlined_call_operand.vmem [shape: f32[1,16], index: 4, kind: input, shape index: {}]   ;;  %s3010_s5 = inlined_call_operand.hbm [shape: f32[3,16,16], index: 5, kind: input, shape index: {}]   ;;  %s3011_s6 = inlined_call_operand.vmem [shape: f32[3,1,16], index: 6, kind: input, shape index: {}]   ;;  %s3012_s7 = inlined_call_operand.hbm [shape: f32[8,16,128], index: 7, kind: output, shape index: {}]  }
   0x1   :  { %3034 = sst [smem:[#allocation21_spill]] %s3006_s1 }
   0x2   :  { %3035 = sst [smem:[#allocation22_spill]] %s3008_s3 }
   0x3   :  { %12 = vsyncpa [#allocation3], 0 }
   0x4   :  { %14 = vsyncpa [#allocation3 + $0x1], 0 }
   0x5   :  { %15 = vsyncpa [#allocation6], 0 }
   0x6   :  { %17 = vsyncpa [#allocation6 + $0x1], 0 }
   0x7   :  { %18 = vsyncpa [#allocation9], 0 }
   0x8   :  { %19 = vsyncpa [#allocation4], 0 }
   0x9   :  { %21 = vsyncpa [#allocation4 + $0x1], 0  ;;  %s2358_s24 = smov 0   ;;  %s2360_s25 = smov 0  }
   0xa   :  { %s2362_s26 = smov 0   ;;  %s2364_s27 = smov 0  }
   0xb LB: > { %3036 = sst [smem:[#allocation16_spill]] %s2291_s24  ;;  %s2379_s28 = sadd.s32 4294967295, %s2303_s27   ;;  %s2303_s27 = sphi %s2364_s27, %s3071_s27   ;;  %s2299_s26 = sphi %s2362_s26, %s3075_s26   ;;  %s2295_s25 = sphi %s2360_s25, %s3074_s25   ;;  %s2291_s24 = sphi %s2358_s24, %s3073_s24  }
   0xc   : > { %3037 = sst [smem:[#allocation17_spill]] %s2303_s27  ;;  %s1796_s29 = sadd.s32 4294967294, %s2303_s27  }
   0xd   : > { %s2383_s30 = sadd.s32 1, %s2303_s27   ;;  %s34_s8 = sadd.s32 1, %s2299_s26 }
   0xe   : > { %3038 = sst [smem:[#allocation18_spill]] %s2383_s30  ;;  %s31_s9 = ssub.s32 %s2303_s27, %s2383_s30 }
   0xf   : > { %p41_p0 = scmp.ne.s32.totalorder %s2299_s26, %s2295_s25  ;;  %p32_p1 = scmp.eq.s32.totalorder %s31_s9, 0 }
  0x10   : > { %p42_p2 = scmp.eq.s32.totalorder %s2303_s27, 0  ;;  %p47_p3 = scmp.ne.s32.totalorder %s2295_s25, %s2291_s24 }
  0x11   : > { %p3014_p4 = scmp.eq.s32.totalorder %s2379_s28, 0  ;;  %p207_p7 = scmp.eq.s32.totalorder %s2379_s28, 1 }
  0x12   : > { %s2395_s10 = scalar_select %p32_p1, %s2299_s26, %s34_s8  }
  0x13   : > { %p2397_p5 = por %p42_p2, %p41_p0  ;;  %p2403_p6 = por %p3014_p4, %p47_p3 }
  0x14   : > { %3039 = sst [smem:[#allocation19_spill]] %s2395_s10  ;;  %p213_p8 = scmp.eq.s32.totalorder %s1796_s29, 1 }
  0x15   : > { %s3040_s11 = scalar_select %p2397_p5, 1, 0 }
  0x16   : > { %s3041_s12 = scalar_select %p2403_p6, 1, 0 }
  0x17   : > { %p1797_p9 = scmp.ge.s32.totalorder %s2303_s27, 1  ;;  %p220_p10 = scmp.lt.s32.totalorder %s2303_s27, 3 }
  0x18   : > { %p2410_p11 = por %p207_p7, %p41_p0  ;;  %p2414_p12 = por %p213_p8, %p47_p3 }
  0x19   : > { %p2418_p13 = pnand %p1797_p9, %p220_p10  ;;  %s2305_s16 = smov [#allocation8]  }
  0x1a   : > { %s3042_s13 = scalar_select %p2410_p11, 1, 0 }
  0x1b   : > { %s3043_s14 = scalar_select %p2414_p12, 1, 0 }
  0x1c   : > { %s3045_s15 = scalar_select %p2418_p13, 1, 0 }
  0x1d   : > { %3044 = sst [smem:[#allocation20_spill]] %s3043_s14  ;;  %p1961_p1 = pneg %p2418_p13 }
  0x1e   : > { %s232_s17 = sshll.u32 %s2305_s16, 4  ;;  %s3013_s19 = sand.u32 1, %s2299_s26   ;;  %s233_s17 = int_to_ptr.vmem [resolvable:$true] %s232_s17 }
  0x1f   : > { %p2426_p2 = pnand %p1961_p1, %p3014_p4  ;;  %s2435_s20 = sshll.u32 %s3013_s19, 6 }
  0x20   : > { %s3047_s3 = sld [smem:[#allocation22_spill]] }
  0x21   : > { %s3046_s18 = scalar_select %p2426_p2, 1, 0 }
  0x22   : > { %p3024_p8 = pneg %p2426_p2 }
  0x26   : > { %s2083_s23 = scalar_lea.hbm %s3047_s3, 1024 }
  0x27   : > { %p2084_p7 = scmp.ne.s32.totalorder %s3047_s3, %s2083_s23  ;;  %p2090_p1 = scmp.lt.u32.totalorder %s2083_s23, %s3047_s3 }
  0x29   : > { %p2086_p9 = pnand %p3024_p8, %p2084_p7 }
  0x2b   : > { %p2087_p10 = pneg %p2086_p9 }
  0x2d   : > { %p2092_p0 = pnand %p2090_p1, %p2087_p10 }
  0x2f   : > { %2095 = shalt.err (!%p2092_p0)
}
  0x30   : > { %s2096_s19 = scalar_lea.vmem %s233_s17, 1024  ;;  %p2104_p11 = scmp.lt.s32.totalorder %s233_s17, %s233_s17 }
  0x31   : > { %p2097_p4 = scmp.ne.s32.totalorder %s233_s17, %s2096_s19  ;;  %p2105_p6 = scmp.lt.s32.totalorder %s2096_s19, %s2096_s19 }
  0x33   : > { %p2099_p3 = pnand %p2097_p4, %p3024_p8  ;;  %p2106_p13 = por %p2105_p6, %p2104_p11 }
  0x35   : > { %p2100_p12 = pneg %p2099_p3 }
  0x37   : > { %p2107_p5 = pnand %p2106_p13, %p2100_p12 }
  0x39   : > { %2110 = shalt.err (!%p2107_p5)
}
  0x3a   : > { %s3020_s21 = smov 128   ;;  %s3022_s22 = smov 8  }
  0x3b   : > { %1964 = dma.hbm_to_vmem [thread:$0]  (!%p2426_p2), %s3047_s3, 1024, %s233_s17, [#allocation9], %s3020_s21, %s3020_s21, %s3022_s22  }
  0x3c   : > { %s2463_s19 = sshll.u32 %s2303_s27, 10  ;;  %p3048_p4 = scmp.ne.s32.totalorder %s3040_s11, 0 }
  0x3d   : > { %p3049_p5 = scmp.lt.s32.totalorder %s2303_s27, 2  ;;  %s287_s9 = sand.u32 1, %s2303_s27  }
  0x3e   : > { %s3051_s1 = sld [smem:[#allocation21_spill]]  ;;  %s291_s17 = scalar_lea.vmem [#allocation5], %s2435_s20 }
  0x3f   : > { %p2469_p6 = pnand %p3049_p5, %p3048_p4  ;;  %s299_s23 = sshll.u32 %s291_s17, 4  ;;  %s2481_s23 = int_to_ptr.vmem [resolvable:$true] %s299_s23 }
  0x40   : > { %s2483_s11 = scalar_lea.sflag [#allocation6], %s287_s9 }
  0x41   : > { %s3050_s8 = scalar_select %p2469_p6, 1, 0 }
  0x42   : > { %p2489_p12 = pneg %p2469_p6 }
  0x44   : > { %s2478_s30 = scalar_lea.hbm %s3051_s1, %s2463_s19  ;;  %s2116_s22 = scalar_lea.hbm %s3051_s1, 2048 }
  0x45   : > { %s2111_s29 = scalar_lea.hbm %s2478_s30, 1024  ;;  %p2117_p3 = scmp.lt.u32.totalorder %s2478_s30, %s3051_s1 }
  0x46   : > { %p2112_p11 = scmp.ne.s32.totalorder %s2478_s30, %s2111_s29  ;;  %p2118_p7 = scmp.lt.u32.totalorder %s2116_s22, %s2111_s29 }
  0x47   : > { %s3052_s21 = scalar_select %p2489_p12, 1, 0 }
  0x48   : > { %p2114_p13 = pnand %p2489_p12, %p2112_p11  ;;  %p2119_p9 = por %p2118_p7, %p2117_p3 }
  0x49   : > { %p2120_p10 = scmp.lt.u32.totalorder %s2111_s29, %s2478_s30 }
  0x4a   : > { %p2115_p0 = pneg %p2114_p13 }
  0x4b   : > { %p2121_p1 = por %p2120_p10, %p2119_p9 }
  0x4d   : > { %p2122_p4 = pnand %p2121_p1, %p2115_p0 }
  0x4f   : > { %2125 = shalt.err (!%p2122_p4)
}
  0x50   : > { %s2126_s9 = scalar_lea.vmem %s2481_s23, 1024  ;;  %s2308_s10 = smov [#allocation5]  }
  0x51   : > { %p2127_p5 = scmp.ne.s32.totalorder %s2481_s23, %s2126_s9  ;;  %s2131_s16 = sshll.u32 %s2308_s10, 4  ;;  %s2132_s16 = int_to_ptr.vmem [resolvable:$false] %s2131_s16 }
  0x52   : > { %s2133_s3 = scalar_lea.vmem %s2132_s16, 2048  ;;  %p2134_p8 = scmp.lt.s32.totalorder %s2481_s23, %s2132_s16 }
  0x53   : > { %p2129_p11 = pnand %p2127_p5, %p2489_p12  ;;  %p2135_p2 = scmp.lt.s32.totalorder %s2133_s3, %s2126_s9 }
  0x55   : > { %p2130_p13 = pneg %p2129_p11  ;;  %p2136_p3 = por %p2135_p2, %p2134_p8 }
  0x57   : > { %p2137_p7 = pnand %p2136_p3, %p2130_p13 }
  0x59   : > { %2140 = shalt.err (!%p2137_p7)
}
  0x5a   : > { %s3053_s22 = smov 8   ;;  %s3054_s29 = smov 128  }
  0x5b   : > { %1974 = dma.hbm_to_vmem [thread:$0]  (!%p2469_p6), %s2478_s30, 1024, %s2481_s23, %s2483_s11, %s3054_s29, %s3054_s29, %s3053_s22  }
  0x5c   : > { %s2309_s17 = smov [#allocation10]   ;;  %s2141_s9 = scalar_lea.hbm %s3010_s5, 768 }
  0x5d   : > { %s248_s1 = sshll.u32 %s2309_s17, 4  ;;  %p2142_p2 = scmp.ne.s32.totalorder %s3010_s5, %s2141_s9  ;;  %s249_s1 = int_to_ptr.vmem [resolvable:$true] %s248_s1 }
  0x5e   : > { %p3055_p8 = scmp.ne.s32.totalorder %s3046_s18, 0  ;;  %p2148_p1 = scmp.lt.u32.totalorder %s2141_s9, %s3010_s5 }
  0x60   : > { %p3056_p0 = pneg %p3055_p8 }
  0x62   : > { %p2144_p9 = pnand %p2142_p2, %p3056_p0 }
  0x64   : > { %p2145_p10 = pneg %p2144_p9 }
  0x66   : > { %p2150_p4 = pnand %p2148_p1, %p2145_p10 }
  0x68   : > { %2153 = shalt.err (!%p2150_p4)
}
  0x69   : > { %s2154_s30 = scalar_lea.vmem %s249_s1, 768  ;;  %p3057_p11 = pmov %p3056_p0 }
  0x6a   : > { %p2155_p5 = scmp.ne.s32.totalorder %s249_s1, %s2154_s30  ;;  %p2162_p7 = scmp.lt.s32.totalorder %s249_s1, %s249_s1 }
  0x6b   : > { %p2163_p6 = scmp.lt.s32.totalorder %s2154_s30, %s2154_s30 }
  0x6c   : > { %p2157_p13 = pnand %p2155_p5, %p3057_p11 }
  0x6d   : > { %p2164_p12 = por %p2163_p6, %p2162_p7 }
  0x6e   : > { %p2158_p3 = pneg %p2157_p13 }
  0x70   : > { %p2165_p0 = pnand %p2164_p12, %p2158_p3 }
  0x72   : > { %2168 = shalt.err (!%p2165_p0)
}
  0x73   : > { %1967 = dma.hbm_to_vmem [thread:$0]  (!%p3055_p8), %s3010_s5, 768, %s249_s1, [#allocation9], %s3054_s29, %s3054_s29, %s3053_s22  }
  0x74   : > { %s2543_s17 = scalar_lea.hbm %s3005_s0, %s2463_s19  ;;  %s269_s18 = scalar_lea.vmem [#allocation2], %s2435_s20 }
  0x75   : > { %s277_s10 = sshll.u32 %s269_s18, 4  ;;  %s3058_s9 = sand.u32 1, %s2299_s26   ;;  %s2546_s10 = int_to_ptr.vmem [resolvable:$true] %s277_s10 }
  0x76   : > { %s2550_s16 = scalar_lea.sflag [#allocation3], %s3058_s9  ;;  %s2169_s3 = scalar_lea.hbm %s2543_s17, 1024 }
  0x77   : > { %p2170_p6 = scmp.ne.s32.totalorder %s2543_s17, %s2169_s3  ;;  %p3059_p12 = scmp.ne.s32.totalorder %s3052_s21, 0 }
  0x78   : > { %s2174_s24 = scalar_lea.hbm %s3005_s0, 2048  ;;  %p2175_p9 = scmp.lt.u32.totalorder %s2543_s17, %s3005_s0 }
  0x79   : > { %p2172_p2 = pnand %p2170_p6, %p3059_p12  ;;  %p2176_p10 = scmp.lt.u32.totalorder %s2174_s24, %s2169_s3 }
  0x7a   : > { %p2178_p4 = scmp.lt.u32.totalorder %s2169_s3, %s2543_s17 }
  0x7b   : > { %p2173_p8 = pneg %p2172_p2  ;;  %p2177_p1 = por %p2176_p10, %p2175_p9 }
  0x7d   : > { %p2179_p5 = por %p2178_p4, %p2177_p1 }
  0x7f   : > { %p2180_p11 = pnand %p2179_p5, %p2173_p8 }
  0x81   : > { %2183 = shalt.err (!%p2180_p11)
}
  0x82   : > { %s2184_s23 = scalar_lea.vmem %s2546_s10, 1024  ;;  %s2310_s18 = smov [#allocation2]  }
  0x83   : > { %p2185_p13 = scmp.ne.s32.totalorder %s2546_s10, %s2184_s23  ;;  %s2189_s9 = sshll.u32 %s2310_s18, 4  ;;  %s2190_s9 = int_to_ptr.vmem [resolvable:$false] %s2189_s9 }
  0x84   : > { %s2191_s1 = scalar_lea.vmem %s2190_s9, 2048  ;;  %p2192_p0 = scmp.lt.s32.totalorder %s2546_s10, %s2190_s9 }
  0x85   : > { %p2187_p3 = pnand %p2185_p13, %p3059_p12  ;;  %p2193_p6 = scmp.lt.s32.totalorder %s2191_s1, %s2184_s23 }
  0x87   : > { %p2188_p7 = pneg %p2187_p3  ;;  %p2194_p2 = por %p2193_p6, %p2192_p0 }
  0x89   : > { %p2195_p9 = pnand %p2194_p2, %p2188_p7 }
  0x8b   : > { %2198 = shalt.err (!%p2195_p9)
}
  0x8c   : > { %p3060_p8 = scmp.ne.s32.totalorder %s3050_s8, 0  ;;  %s2581_s24 = scalar_lea.hbm %s3007_s2, %s2463_s19 }
  0x8d   : > { %s313_s27 = scalar_lea.vmem [#allocation7], %s2435_s20  ;;  %s2199_s23 = scalar_lea.hbm %s2581_s24, 1024 }
  0x8e   : > { %1971 = dma.hbm_to_vmem [thread:$0]  (!%p3060_p8), %s2543_s17, 1024, %s2546_s10, %s2550_s16, %s3054_s29, %s3054_s29, %s3053_s22  }
  0x8f   : > { %s321_s14 = sshll.u32 %s313_s27, 4  ;;  %p2200_p10 = scmp.ne.s32.totalorder %s2581_s24, %s2199_s23  ;;  %s2584_s14 = int_to_ptr.vmem [resolvable:$true] %s321_s14 }
  0x90   : > { %s2204_s10 = scalar_lea.hbm %s3007_s2, 2048  ;;  %p2205_p5 = scmp.lt.u32.totalorder %s2581_s24, %s3007_s2 }
  0x91   : > { %p2202_p1 = pnand %p2200_p10, %p3059_p12  ;;  %p2206_p11 = scmp.lt.u32.totalorder %s2204_s10, %s2199_s23 }
  0x92   : > { %p2208_p3 = scmp.lt.u32.totalorder %s2199_s23, %s2581_s24 }
  0x93   : > { %p2203_p4 = pneg %p2202_p1  ;;  %p2207_p13 = por %p2206_p11, %p2205_p5 }
  0x95   : > { %p2209_p7 = por %p2208_p3, %p2207_p13 }
  0x97   : > { %p2210_p0 = pnand %p2209_p7, %p2203_p4 }
  0x99   : > { %2213 = shalt.err (!%p2210_p0)
}
  0x9a   : > { %s2214_s20 = scalar_lea.vmem %s2584_s14, 1024  ;;  %s2311_s9 = smov [#allocation7]  }
  0x9b   : > { %p2215_p6 = scmp.ne.s32.totalorder %s2584_s14, %s2214_s20  ;;  %s2219_s1 = sshll.u32 %s2311_s9, 4  ;;  %s2220_s1 = int_to_ptr.vmem [resolvable:$false] %s2219_s1 }
  0x9c   : > { %s2221_s3 = scalar_lea.vmem %s2220_s1, 2048  ;;  %p2222_p10 = scmp.lt.s32.totalorder %s2584_s14, %s2220_s1 }
  0x9d   : > { %p2217_p2 = pnand %p2215_p6, %p3059_p12  ;;  %p2223_p1 = scmp.lt.s32.totalorder %s2221_s3, %s2214_s20 }
  0x9f   : > { %p2218_p9 = pneg %p2217_p2  ;;  %p2224_p5 = por %p2223_p1, %p2222_p10 }
  0xa1   : > { %p2225_p11 = pnand %p2224_p5, %p2218_p9 }
  0xa3   : > { %2228 = shalt.err (!%p2225_p11)
}
  0xa4   : > { %1977 = dma.hbm_to_vmem [thread:$0]  (!%p3060_p8), %s2581_s24, 1024, %s2584_s14, %s2483_s11, %s3054_s29, %s3054_s29, %s3053_s22  }
  0xa5   : > { %p3061_p12 = scmp.ne.s32.totalorder %s3045_s15, 0 }
  0xa6   : > { %s2614_s21 = sand.u32 (!%p3061_p12), 1, %s2295_s25   ;;  %p3062_p4 = scmp.ne.s32.totalorder (!%p3061_p12), %s3041_s12, 0 }
  0xa7   : > { %333 = sbr.rel (%p3061_p12) target bundleno = 1198 (0x4ae), region = 48  ;;  %s2617_s30 = sshll.u32 (!%p3061_p12), %s2614_s21, 6 }
  0xa8   : > { %s336_s8 = scalar_lea.sflag (!%p3061_p12), [#allocation3], %s2614_s21  ;;  %s2621_s27 = scalar_lea.vmem (!%p3061_p12), [#allocation2], %s2617_s30 }
  0xae   : > { %2274 = dma.done.wait (%p3062_p4), %s336_s8, 1024  }
  0xaf   : > { %2276 = vsyncadd (%p3062_p4), %s336_s8, 4294966272  ;;  %s344_s15 = sand.u32 1, %s2379_s28   ;;  %s2629_s22 = scalar_lea.vmem [#allocation5], %s2617_s30 }
  0xb0   : > { %s345_s11 = scalar_lea.sflag [#allocation6], %s344_s15 }
  0xb1   : > { %2278 = dma.done.wait (%p3062_p4), %s345_s11, 2048  }
  0xb2   : > { %2280 = vsyncadd (%p3062_p4), %s345_s11, 4294965248  ;;  %s2636_s29 = scalar_lea.vmem [#allocation7], %s2617_s30  ;;  %p3063_p8 = scmp.eq.s32.totalorder %s2379_s28, 0 }
  0xb4   : > { %2282 = dma.done.wait (%p3063_p8), [#allocation9], 1792   ;;  %p3064_p13 = pmov %p3063_p8 }
  0xb5   : > { %v412_v0 = vld [vmem:[%s2621_s27 + $0x10] sm:$0xff]  ;;  %v2646_v4 = vld [vmem:[%s2621_s27] sm:$0xff]  ;;  %v413_v8 = vld [vmem:[%s2621_s27 + $0x18] sm:$0xff]  ;;  %v2312_v43 = vmov 0.0|0.0   ;;  %vm2313_vm0 = vmmov 0   ;;  %v2314_v44 = vmov 0.0   ;;  %v709_v45 = vlaneseq }
  0xb6   : > { %2284 = vsyncadd (%p3064_p13), [#allocation9], 4294965504  ;;  %v420_v1 = vld [vmem:[%s2629_s22 + $0x10] sm:$0xff]  ;;  %v2649_v5 = vld [vmem:[%s2629_s22] sm:$0xff]  ;;  %1917 = vmatprep.subr.bf16.mxu0 %v2312_v43  ;;  %1929 = vmatprep.subr.bf16.mxu1 %v2312_v43  ;;  %vm720_vm1 = vcmask 130112   ;;  %vm749_vm2 = vcmask 1041409  }
  0xb7   : > { %v436_v2 = vld [vmem:[%s2636_s29 + $0x10] sm:$0xff]  ;;  %v428_v3 = vadd.f32 %v420_v1, %v412_v0  ;;  %v2652_v6 = vld [vmem:[%s2636_s29] sm:$0xff]  ;;  %v426_v7 = vadd.f32 %v2649_v5, %v2646_v4  ;;  %v421_v9 = vld [vmem:[%s2629_s22 + $0x18] sm:$0xff]  ;;  %1872 = vmatprep.mubr.msk.f32.mxu0 %vm2313_vm0, %v2314_v44  ;;  %1900 = vmatprep.mubr.msk.f32.mxu1 %vm2313_vm0, %v2314_v44  ;;  %v710_v46 = vand.u32 127, %v709_v45  ;;  %v2715_v52 = vshrl.u32 %v709_v45, 7  ;;  %s2926_s19 = scalar_lea.vmem [#allocation11], %s2617_s30 }
  0xb8   : > { %v437_v10 = vld [vmem:[%s2636_s29 + $0x18] sm:$0xff]  ;;  %v429_v12 = vadd.f32 %v421_v9, %v413_v8  ;;  %v411_v13 = vld [vmem:[%s2621_s27 + $0x8] sm:$0xff]  ;;  %v2671_v22 = vld [vmem:[%s2621_s27 + $0x20] sm:$0xff]  ;;  %vm751_vm3 = vcmask 1042434   ;;  %vm753_vm4 = vcmask 1043459   ;;  %vm755_vm5 = vcmask 130048  }
  0xb9   : > { %v444_v11 = vadd.f32 %v436_v2, %v428_v3  ;;  %v2661_v14 = vld [vmem:[%s2629_s22 + $0x8] sm:$0xff]  ;;  %v442_v16 = vadd.f32 %v2652_v6, %v426_v7  ;;  %v2674_v23 = vld [vmem:[%s2629_s22 + $0x20] sm:$0xff]  ;;  %v417_v27 = vld [vmem:[%s2621_s27 + $0x38] sm:$0xff]  ;;  %v715_v50 = vadd.s32 4294967288, %v710_v46  ;;  %v2723_v61 = vsub.s32 %v710_v46, %v2715_v52  ;;  %s1661_s20 = sshll.u32 %s2926_s19, 4  ;;  %s1846_s9 = sshll.u32 %s2379_s28, 10  ;;  %s2953_s20 = int_to_ptr.vmem [resolvable:$true] %s1661_s20 }
  0xba   : > { %v435_v15 = vld [vmem:[%s2636_s29 + $0x8] sm:$0xff]  ;;  %v427_v17 = vadd.f32 %v2661_v14, %v411_v13  ;;  %v2668_v20 = vadd.f32 %v437_v10, %v429_v12  ;;  %v430_v26 = vadd.f32 %v2674_v23, %v2671_v22  ;;  %v425_v28 = vld [vmem:[%s2629_s22 + $0x38] sm:$0xff]  ;;  %v2682_v29 = vld [vmem:[%s2636_s29 + $0x20] sm:$0xff]  ;;  %s2960_s30 = scalar_lea.hbm %s3012_s7, %s1846_s9  ;;  %s1647_s8 = scalar_lea.sflag [#allocation4], %s2614_s21 }
  0xbb   : > { %v415_v18 = vld [vmem:[%s2621_s27 + $0x28] sm:$0xff]  ;;  %454 = vadd.xlane.f32.xlu1 %v444_v11  ;;  %450 = vadd.xlane.f32.xlu0 %v442_v16  ;;  %v2685_v30 = vld [vmem:[%s2621_s27 + $0x30] sm:$0xff]  ;;  %v433_v33 = vadd.f32 %v425_v28, %v417_v27  ;;  %v441_v35 = vld [vmem:[%s2636_s29 + $0x38] sm:$0xff]  ;;  %v2718_v56 = vsub.s32 %v715_v50, %v2715_v52  ;;  %p3065_p7 = scmp.ne.s32.totalorder %s3042_s13, 0  ;;  %s2315_s28 = smov [#allocation11]  }
  0xbc   : > { %v423_v19 = vld [vmem:[%s2629_s22 + $0x28] sm:$0xff]  ;;  %v443_v24 = vadd.f32 %v435_v15, %v427_v17  ;;  %v2688_v31 = vld [vmem:[%s2629_s22 + $0x30] sm:$0xff]  ;;  %v446_v34 = vadd.f32 %v2682_v29, %v430_v26  ;;  %v699_v40 = vld [vmem:[#allocation8] sm:$0xff]  ;;  %s2233_s15 = sshll.u32 %s2315_s28, 4  ;;  %s2234_s15 = int_to_ptr.vmem [resolvable:$false] %s2233_s15 }
  0xbd   : > { %v431_v21 = vadd.f32 %v423_v19, %v415_v18  ;;  %v439_v25 = vld [vmem:[%s2636_s29 + $0x28] sm:$0xff]  ;;  %v432_v36 = vadd.f32 %v2688_v31, %v2685_v30  ;;  %v2698_v37 = vld [vmem:[%s2636_s29 + $0x30] sm:$0xff]  ;;  %v2701_v38 = vadd.f32 %v441_v35, %v433_v33  ;;  %s2235_s11 = scalar_lea.vmem %s2234_s15, 2048  ;;  %p2236_p2 = scmp.lt.s32.totalorder %s2953_s20, %s2234_s15 }
  0xbe   : > { %v700_v41 = vld [vmem:[#allocation8 + $0x8] sm:$0xff] }
  0xbf   : > { %456 = vadd.xlane.f32.xlu1 %v2668_v20  ;;  %v2691_v32 = vadd.f32 %v439_v25, %v431_v21  ;;  %452 = vadd.xlane.f32.xlu0 %v443_v24  ;;  %v2704_v39 = vadd.f32 %v2698_v37, %v432_v36  ;;  %v1918_v42 = vpack.c.bf16 %v700_v41, %v699_v40 }
  0xc1   : > { %1919 = vmatpush3.bf16.msra.mxu0 %v1918_v42 }
  0xc2   : > { %1920 = vmatprep.subr.bf16.mxu0 %v2312_v43 }
  0xc3   : > { %460 = vadd.xlane.f32.xlu1 %v2691_v32  ;;  %458 = vadd.xlane.f32.xlu0 %v446_v34 }
  0xc7   : > { %464 = vadd.xlane.f32.xlu1 %v2701_v38  ;;  %462 = vadd.xlane.f32.xlu0 %v2704_v39 }
 0x148   : > { %v455_v47 = vpop.xlane.xlu1 %454  ;;  %v451_v49 = vpop.xlane.xlu0 %450 }
 0x149   : > { %v468_v48 = vmul.f32 0.0078125, %v455_v47  ;;  %v466_v51 = vmul.f32 0.0078125, %v451_v49 }
 0x14b   : > { %v474_v53 = vsub.f32 %v442_v16, %v466_v51  ;;  %v476_v55 = vsub.f32 %v444_v11, %v468_v48  ;;  %v725_v0 = vrot.slane %v468_v48, %v2723_v61  ;;  %v714_v13 = vrot.slane %v466_v51, %v2723_v61 }
 0x14c   : > { %v457_v54 = vpop.xlane.xlu1 %456  ;;  %v453_v58 = vpop.xlane.xlu0 %452 }
 0x14d   : > { %v469_v57 = vmul.f32 0.0078125, %v457_v54  ;;  %v467_v59 = vmul.f32 0.0078125, %v453_v58  ;;  %v2720_v60 = vmul.f32 %v474_v53, %v474_v53  ;;  %v484_v7 = vmul.f32 %v476_v55, %v476_v55 }
 0x14f   : > { %v475_v62 = vsub.f32 %v443_v24, %v467_v59  ;;  %490 = vadd.xlane.f32.xlu0 %v2720_v60  ;;  %v729_v1 = vrot.slane %v469_v57, %v2718_v56  ;;  %v477_v8 = vsub.f32 %v2668_v20, %v469_v57  ;;  %v719_v9 = vrot.slane %v467_v59, %v2718_v56 }
 0x150   : > { %v461_v63 = vpop.xlane.xlu1 %460  ;;  %v459_v3 = vpop.xlane.xlu0 %458  ;;  %v506_v47 = vmul.f32 %v2720_v60, %v474_v53  ;;  %v508_v48 = vmul.f32 %v484_v7, %v476_v55  ;;  %v530_v58 = vmul.f32 %v2720_v60, %v2720_v60  ;;  %v532_v59 = vmul.f32 %v484_v7, %v484_v7  ;;  %v1204_v60 = vld [vmem:[#allocation10] sm:$0xff] }
 0x151   : > { %v471_v2 = vmul.f32 0.0078125, %v461_v63  ;;  %v470_v10 = vmul.f32 0.0078125, %v459_v3  ;;  %v483_v11 = vmul.f32 %v475_v62, %v475_v62  ;;  %v730_v18 = vsel %vm720_vm1, %v729_v1, %v725_v0  ;;  %v837_v3 = vld [vmem:[#allocation8 + $0x18] sm:$0xff] }
 0x152   : > { %v721_v24 = vsel %vm720_vm1, %v719_v9, %v714_v13  ;;  %v485_v26 = vmul.f32 %v477_v8, %v477_v8 }
 0x153   : > { %v738_v12 = vrot.slane %v471_v2, %v2718_v56  ;;  %v478_v15 = vsub.f32 %v446_v34, %v470_v10  ;;  %v734_v16 = vrot.slane %v470_v10, %v2723_v61  ;;  %494 = vadd.xlane.f32.xlu0 %v484_v7  ;;  %492 = vadd.xlane.f32.xlu1 %v483_v11  ;;  %v1205_v7 = vld [vmem:[#allocation10 + $0x8] sm:$0xff] }
 0x154   : > { %v465_v17 = vpop.xlane.xlu1 %464  ;;  %v479_v19 = vsub.f32 %v2691_v32, %v471_v2  ;;  %v463_v20 = vpop.xlane.xlu0 %462  ;;  %v750_v36 = vsel %vm749_vm2, %v730_v18, %v721_v24  ;;  %v509_v49 = vmul.f32 %v485_v26, %v477_v8  ;;  %v531_v53 = vmul.f32 %v483_v11, %v483_v11  ;;  %v836_v2 = vld [vmem:[#allocation8 + $0x10] sm:$0xff] }
 0x155   : > { %v473_v21 = vmul.f32 0.0078125, %v465_v17  ;;  %v472_v25 = vmul.f32 0.0078125, %v463_v20  ;;  %v486_v27 = vmul.f32 %v478_v15, %v478_v15  ;;  %v739_v28 = vsel %vm720_vm1, %v738_v12, %v734_v16 }
 0x156   : > { %v487_v32 = vmul.f32 %v479_v19, %v479_v19  ;;  %v752_v42 = vsel %vm751_vm3, %v739_v28, %v750_v36  ;;  %v533_v55 = vmul.f32 %v485_v26, %v485_v26  ;;  %v1921_v8 = vpack.c.bf16 %v837_v3, %v836_v2 }
 0x157   : > { %v747_v33 = vrot.slane %v473_v21, %v2718_v56  ;;  %v480_v34 = vsub.f32 %v2704_v39, %v472_v25  ;;  %v743_v35 = vrot.slane %v472_v25, %v2723_v61  ;;  %496 = vadd.xlane.f32.xlu1 %v485_v26  ;;  %498 = vadd.xlane.f32.xlu0 %v486_v27 }
 0x158   : > { %v481_v40 = vsub.f32 %v2701_v38, %v473_v21  ;;  %v507_v38 = vmul.f32 %v483_v11, %v475_v62  ;;  %v510_v50 = vmul.f32 %v486_v27, %v478_v15  ;;  %v511_v51 = vmul.f32 %v487_v32, %v479_v19 }
 0x159   : > { %v748_v41 = vsel %vm720_vm1, %v747_v33, %v743_v35  ;;  %v488_v45 = vmul.f32 %v480_v34, %v480_v34  ;;  %v534_v62 = vmul.f32 %v486_v27, %v486_v27  ;;  %v535_v63 = vmul.f32 %v487_v32, %v487_v32 }
 0x15a   : > { %v754_v46 = vsel %vm753_vm4, %v748_v41, %v752_v42  ;;  %v489_v39 = vmul.f32 %v481_v40, %v481_v40  ;;  %v1930_v9 = vpack.c.bf16 %v1205_v7, %v1204_v60 }
 0x15b   : > { %500 = vadd.xlane.f32.xlu1 %v487_v32  ;;  %1873 = vmatmul.mubr.msk.f32.vlgmr.msra.gmra.mrb[0].mxu0 %vm755_vm5, %v754_v46  ;;  %v512_v54 = vmul.f32 %v488_v45, %v480_v34  ;;  %v536_v0 = vmul.f32 %v488_v45, %v488_v45 }
 0x15c   : > { %502 = vadd.xlane.f32.xlu0 %v488_v45  ;;  %1879 = vmatprep.mubr.msk.f32.mxu0 %vm2313_vm0, %v2314_v44  ;;  %v513_v57 = vmul.f32 %v489_v39, %v481_v40  ;;  %v537_v1 = vmul.f32 %v489_v39, %v489_v39 }
 0x15d   : > { %1922 = vmatpush3.bf16.msra.mxu0 %v1921_v8  ;;  %1931 = vmatpush3.bf16.msra.mxu1 %v1930_v9 }
 0x15e   : > { %1923 = vmatprep.subr.bf16.mxu0 %v2312_v43  ;;  %1932 = vmatprep.subr.bf16.mxu1 %v2312_v43 }
 0x15f   : > { %504 = vadd.xlane.f32.xlu1 %v489_v39 }
 0x160   : > { %514 = vadd.xlane.f32.xlu0 %v506_v47 }
 0x163   : > { %516 = vadd.xlane.f32.xlu1 %v507_v38 }
 0x164   : > { %518 = vadd.xlane.f32.xlu0 %v508_v48 }
 0x167   : > { %520 = vadd.xlane.f32.xlu1 %v509_v49 }
 0x168   : > { %522 = vadd.xlane.f32.xlu0 %v510_v50 }
 0x16b   : > { %524 = vadd.xlane.f32.xlu1 %v511_v51 }
 0x16c   : > { %526 = vadd.xlane.f32.xlu0 %v512_v54 }
 0x16f   : > { %528 = vadd.xlane.f32.xlu1 %v513_v57 }
 0x170   : > { %538 = vadd.xlane.f32.xlu0 %v530_v58 }
 0x173   : > { %540 = vadd.xlane.f32.xlu1 %v531_v53 }
 0x174   : > { %542 = vadd.xlane.f32.xlu0 %v532_v59 }
 0x177   : > { %544 = vadd.xlane.f32.xlu1 %v533_v55 }
 0x178   : > { %546 = vadd.xlane.f32.xlu0 %v534_v62 }
 0x17b   : > { %548 = vadd.xlane.f32.xlu1 %v535_v63 }
 0x17c   : > { %550 = vadd.xlane.f32.xlu0 %v536_v0 }
 0x17f   : > { %552 = vadd.xlane.f32.xlu1 %v537_v1 }
 0x1dc   : > { %v491_v10 = vpop.xlane.xlu0 %490 }
 0x1dd   : > { %v554_v11 = vmul.f32 0.007874016, %v491_v10 }
 0x1df   : > { %2029 = vrsqrt.f32 %v554_v11  ;;  %vm564_vm6 = vcmp.eq.f32.partialorder %v554_v11, inf  ;;  %v567_v33 = vand.u32 2147483648, %v554_v11  ;;  %vm566_vm7 = vcmp.eq.f32.partialorder %v554_v11, 0.0 }
 0x1e0   : > { %v493_v12 = vpop.xlane.xlu1 %492  ;;  %v495_v13 = vpop.xlane.xlu0 %494 }
 0x1e1   : > { %v555_v15 = vmul.f32 0.007874016, %v493_v12  ;;  %v556_v16 = vmul.f32 0.007874016, %v495_v13 }
 0x1e3   : > { %2031 = vrsqrt.f32 %v555_v15  ;;  %vm571_vm8 = vcmp.eq.f32.partialorder %v555_v15, inf  ;;  %v574_v46 = vand.u32 2147483648, %v555_v15  ;;  %vm578_vm9 = vcmp.eq.f32.partialorder %v556_v16, inf }
 0x1e4   : > { %2033 = vrsqrt.f32 %v556_v16  ;;  %v497_v17 = vpop.xlane.xlu1 %496  ;;  %v499_v18 = vpop.xlane.xlu0 %498  ;;  %v581_v38 = vand.u32 2147483648, %v556_v16  ;;  %vm573_vm10 = vcmp.eq.f32.partialorder %v555_v15, 0.0  ;;  %vm580_vm12 = vcmp.eq.f32.partialorder %v556_v16, 0.0 }
 0x1e5   : > { %v557_v19 = vmul.f32 0.007874016, %v497_v17  ;;  %v2753_v21 = vmul.f32 0.007874016, %v499_v18 }
 0x1e7   : > { %2035 = vrsqrt.f32 %v557_v19  ;;  %vm585_vm11 = vcmp.eq.f32.partialorder %v557_v19, inf  ;;  %v588_v51 = vand.u32 2147483648, %v557_v19  ;;  %vm592_vm13 = vcmp.eq.f32.partialorder %v2753_v21, inf }
 0x1e8   : > { %2037 = vrsqrt.f32 %v2753_v21  ;;  %v501_v20 = vpop.xlane.xlu1 %500  ;;  %v595_v55 = vand.u32 2147483648, %v2753_v21  ;;  %vm587_vm14 = vcmp.eq.f32.partialorder %v557_v19, 0.0  ;;  %vm594_vm15 = vcmp.eq.f32.partialorder %v2753_v21, 0.0 }
 0x1e9   : > { %v2030_v24 = vpop.eup %2029  ;;  %v2756_v25 = vmul.f32 0.007874016, %v501_v20  ;;  %v503_v26 = vpop.xlane.xlu0 %502 }
 0x1ea   : > { %v563_v27 = vmul.f32 %v2030_v24, %v554_v11  ;;  %v2758_v28 = vmul.f32 0.007874016, %v503_v26 }
 0x1eb   : > { %2039 = vrsqrt.f32 %v2756_v25  ;;  %v602_v2 = vand.u32 2147483648, %v2756_v25 }
 0x1ec   : > { %2041 = vrsqrt.f32 %v2758_v28  ;;  %v505_v34 = vpop.xlane.xlu1 %504  ;;  %v565_v35 = vsel %vm564_vm6, %v554_v11, %v563_v27  ;;  %vm599_vm6 = vcmp.eq.f32.partialorder %v2756_v25, inf  ;;  %v609_v17 = vand.u32 2147483648, %v2758_v28 }
 0x1ed   : > { %v2032_v32 = vpop.eup %2031  ;;  %v2762_v36 = vmul.f32 0.007874016, %v505_v34  ;;  %v2764_v40 = vsel %vm566_vm7, %v567_v33, %v565_v35  ;;  %v2766_v41 = vpop.xlane.xlu0 %514  ;;  %vm601_vm7 = vcmp.eq.f32.partialorder %v2756_v25, 0.0 }
 0x1ee   : > { %v2034_v42 = vpop.eup %2033  ;;  %v570_v45 = vmul.f32 %v2032_v32, %v555_v15  ;;  %v618_v39 = vmax.f32 %v2764_v40, 0.01 }
 0x1ef   : > { %v577_v47 = vmul.f32 %v2034_v42, %v556_v16  ;;  %2043 = vrsqrt.f32 %v2762_v36 }
 0x1f0   : > { %2045 = vrcp.f32 %v618_v39  ;;  %v572_v48 = vsel %vm571_vm8, %v555_v15, %v570_v45  ;;  %v2770_v49 = vpop.xlane.xlu1 %516  ;;  %vm606_vm8 = vcmp.eq.f32.partialorder %v2758_v28, inf }
 0x1f1   : > { %v2036_v50 = vpop.eup %2035  ;;  %v2773_v54 = vsel %vm573_vm10, %v574_v46, %v572_v48  ;;  %v579_v57 = vsel %vm578_vm9, %v556_v16, %v577_v47  ;;  %v2775_v58 = vpop.xlane.xlu0 %518  ;;  %vm608_vm9 = vcmp.eq.f32.partialorder %v2758_v28, 0.0  ;;  %vm613_vm10 = vcmp.eq.f32.partialorder %v2762_v36, inf }
 0x1f2   : > { %v2038_v53 = vpop.eup %2037  ;;  %v584_v59 = vmul.f32 %v2036_v50, %v557_v19  ;;  %v619_v62 = vmax.f32 %v2773_v54, 0.01  ;;  %v582_v63 = vsel %vm580_vm12, %v581_v38, %v579_v57  ;;  %v616_v46 = vand.u32 2147483648, %v2762_v36  ;;  %v959_v50 = vld [vmem:[#allocation8 + $0x20] sm:$0xff] }
 0x1f3   : > { %v591_v0 = vmul.f32 %v2038_v53, %v2753_v21  ;;  %v620_v1 = vmax.f32 %v582_v63, 0.01  ;;  %v853_v39 = vrot.slane %v2773_v54, %v2718_v56 }
 0x1f4   : > { %2047 = vrcp.f32 %v619_v62  ;;  %v586_v3 = vsel %vm585_vm11, %v557_v19, %v584_v59  ;;  %v2784_v8 = vpop.xlane.xlu1 %520  ;;  %v849_v19 = vrot.slane %v2764_v40, %v2723_v61  ;;  %vm615_vm11 = vcmp.eq.f32.partialorder %v2762_v36, 0.0 }
 0x1f5   : > { %v2040_v60 = vpop.eup %2039  ;;  %2049 = vrcp.f32 %v620_v1  ;;  %v589_v7 = vsel %vm587_vm14, %v588_v51, %v586_v3  ;;  %v593_v9 = vsel %vm592_vm13, %v2753_v21, %v591_v0  ;;  %v2789_v10 = vpop.xlane.xlu0 %522  ;;  %v960_v51 = vld [vmem:[#allocation8 + $0x28] sm:$0xff] }
 0x1f6   : > { %v2042_v11 = vpop.eup %2041  ;;  %v598_v12 = vmul.f32 %v2040_v60, %v2756_v25  ;;  %v621_v13 = vmax.f32 %v589_v7, 0.01  ;;  %v596_v15 = vsel %vm594_vm15, %v595_v55, %v593_v9  ;;  %v862_v26 = vrot.slane %v589_v7, %v2718_v56 }
 0x1f7   : > { %v605_v16 = vmul.f32 %v2042_v11, %v2758_v28  ;;  %v622_v18 = vmax.f32 %v596_v15, 0.01  ;;  %v867_v48 = vrot.slane %v596_v15, %v2723_v61  ;;  %v854_v3 = vsel %vm720_vm1, %v853_v39, %v849_v19 }
 0x1f8   : > { %2051 = vrcp.f32 %v621_v13  ;;  %v600_v20 = vsel %vm599_vm6, %v2756_v25, %v598_v12  ;;  %v2805_v24 = vpop.xlane.xlu1 %524  ;;  %v858_v25 = vrot.slane %v582_v63, %v2723_v61  ;;  %v1924_v60 = vpack.c.bf16 %v960_v51, %v959_v50 }
 0x1f9   : > { %v2044_v21 = vpop.eup %2043  ;;  %2053 = vrcp.f32 %v622_v18  ;;  %v603_v27 = vsel %vm601_vm7, %v602_v2, %v600_v20  ;;  %v607_v33 = vsel %vm606_vm8, %v2758_v28, %v605_v16  ;;  %v2813_v34 = vpop.xlane.xlu0 %526 }
 0x1fa   : > { %v2046_v35 = vpop.eup %2045  ;;  %v612_v32 = vmul.f32 %v2044_v21, %v2762_v36  ;;  %v623_v40 = vmax.f32 %v603_v27, 0.01  ;;  %v610_v42 = vsel %vm608_vm9, %v609_v17, %v607_v33  ;;  %v871_v45 = vrot.slane %v603_v27, %v2718_v56 }
 0x1fb   : > { %v624_v47 = vmax.f32 %v610_v42, 0.01  ;;  %v642_v57 = vmul.f32 %v2046_v35, %v2046_v35  ;;  %v863_v54 = vsel %vm720_vm1, %v862_v26, %v858_v25  ;;  %v876_v63 = vrot.slane %v610_v42, %v2723_v61  ;;  %v2843_v42 = vld [vmem:[#allocation8 + $0x38] sm:$0xff] }
 0x1fc   : > { %2055 = vrcp.f32 %v623_v40  ;;  %v614_v28 = vsel %vm613_vm10, %v2762_v36, %v612_v32  ;;  %v2825_v38 = vpop.xlane.xlu1 %528  ;;  %v872_v62 = vsel %vm720_vm1, %v871_v45, %v867_v48  ;;  %v882_v12 = vsel %vm749_vm2, %v863_v54, %v854_v3 }
 0x1fd   : > { %2057 = vrcp.f32 %v624_v47  ;;  %v617_v53 = vsel %vm615_vm11, %v616_v46, %v614_v28  ;;  %v539_v2 = vpop.xlane.xlu0 %538  ;;  %v883_v13 = vsel %vm751_vm3, %v872_v62, %v882_v12  ;;  %v650_v16 = vmul.f32 %v2046_v35, %v642_v57  ;;  %v2841_v35 = vld [vmem:[#allocation8 + $0x30] sm:$0xff] }
 0x1fe   : > { %v2048_v59 = vpop.eup %2047  ;;  %v625_v55 = vmax.f32 %v617_v53, 0.01  ;;  %v880_v0 = vrot.slane %v617_v53, %v2718_v56  ;;  %v674_v33 = vmul.f32 %v642_v57, %v642_v57  ;;  %v1927_v54 = vpack.c.bf16 %v2843_v42, %v2841_v35 }
 0x1ff   : > { %v2050_v36 = vpop.eup %2049  ;;  %v643_v1 = vmul.f32 %v2048_v59, %v2048_v59  ;;  %v658_v46 = vmul.f32 %v650_v16, %v2766_v41 }
 0x200   : > { %v644_v7 = vmul.f32 %v2050_v36, %v2050_v36  ;;  %2059 = vrcp.f32 %v625_v55  ;;  %v541_v9 = vpop.xlane.xlu1 %540  ;;  %v881_v11 = vsel %vm720_vm1, %v880_v0, %v876_v63  ;;  %v682_v62 = vmul.f32 %v674_v33, %v539_v2 }
 0x201   : > { %v651_v17 = vmul.f32 %v2048_v59, %v643_v1  ;;  %v884_v18 = vsel %vm753_vm4, %v881_v11, %v883_v13  ;;  %v543_v32 = vpop.xlane.xlu0 %542  ;;  %v675_v51 = vmul.f32 %v643_v1, %v643_v1 }
 0x202   : > { %v2052_v15 = vpop.eup %2051  ;;  %v652_v21 = vmul.f32 %v2050_v36, %v644_v7  ;;  %1880 = vmatmul.mubr.msk.f32.vlgmr.msra.gmra.mrb[0].mxu0 %vm755_vm5, %v884_v18  ;;  %v676_v3 = vmul.f32 %v644_v7, %v644_v7 }
 0x203   : > { %v2054_v20 = vpop.eup %2053  ;;  %v645_v26 = vmul.f32 %v2052_v15, %v2052_v15  ;;  %1925 = vmatpush3.bf16.msra.mxu0 %v1924_v60  ;;  %1886 = vmatprep.mubr.msk.f32.mxu0 %vm2313_vm0, %v2314_v44  ;;  %v659_v39 = vmul.f32 %v651_v17, %v2770_v49  ;;  %v666_v49 = vmul.f32 0.0078125, %v658_v46  ;;  %v683_v1 = vmul.f32 %v675_v51, %v541_v9 }
 0x204   : > { %v646_v19 = vmul.f32 %v2054_v20, %v2054_v20  ;;  %v545_v40 = vpop.xlane.xlu1 %544  ;;  %1926 = vmatprep.subr.bf16.mxu0 %v2312_v43  ;;  %v660_v28 = vmul.f32 %v652_v21, %v2775_v58 }
 0x205   : > { %v653_v27 = vmul.f32 %v2052_v15, %v645_v26  ;;  %v677_v41 = vmul.f32 %v645_v26, %v645_v26  ;;  %v667_v0 = vmul.f32 0.0078125, %v659_v39  ;;  %v547_v11 = vpop.xlane.xlu0 %546  ;;  %v972_v21 = vrot.slane %v666_v49, %v2723_v61 }
 0x206   : > { %v2056_v45 = vpop.eup %2055  ;;  %v654_v25 = vmul.f32 %v2054_v20, %v646_v19  ;;  %v668_v58 = vmul.f32 0.0078125, %v660_v28  ;;  %v678_v15 = vmul.f32 %v646_v19, %v646_v19  ;;  %v684_v26 = vmul.f32 %v676_v3, %v543_v32 }
 0x207   : > { %v2058_v47 = vpop.eup %2057  ;;  %v661_v48 = vmul.f32 %v653_v27, %v2784_v8  ;;  %v647_v50 = vmul.f32 %v2056_v45, %v2056_v45  ;;  %v685_v20 = vmul.f32 %v677_v41, %v545_v40  ;;  %v976_v7 = vrot.slane %v667_v0, %v2718_v56 }
 0x208   : > { %v662_v57 = vmul.f32 %v654_v25, %v2789_v10  ;;  %v648_v53 = vmul.f32 %v2058_v47, %v2058_v47  ;;  %v549_v10 = vpop.xlane.xlu1 %548  ;;  %v981_v9 = vrot.slane %v668_v58, %v2723_v61  ;;  %v690_v49 = vmul.f32 0.0078125, %v682_v62 }
 0x209   : > { %v669_v59 = vmul.f32 0.0078125, %v661_v48  ;;  %v655_v55 = vmul.f32 %v2056_v45, %v647_v50  ;;  %v679_v16 = vmul.f32 %v647_v50, %v647_v50  ;;  %v686_v45 = vmul.f32 %v678_v15, %v547_v11  ;;  %v551_v48 = vpop.xlane.xlu0 %550 }
 0x20a   : > { %v2060_v63 = vpop.eup %2059  ;;  %v656_v36 = vmul.f32 %v2058_v47, %v648_v53  ;;  %v670_v12 = vmul.f32 0.0078125, %v662_v57  ;;  %v680_v46 = vmul.f32 %v648_v53, %v648_v53  ;;  %v691_v47 = vmul.f32 0.0078125, %v683_v1 }
 0x20b   : > { %v663_v8 = vmul.f32 %v655_v55, %v2805_v24  ;;  %v649_v60 = vmul.f32 %v2060_v63, %v2060_v63  ;;  %v985_v2 = vrot.slane %v669_v59, %v2718_v56  ;;  %v687_v24 = vmul.f32 %v679_v16, %v549_v10 }
 0x20c   : > { %v664_v13 = vmul.f32 %v656_v36, %v2813_v34  ;;  %v990_v19 = vrot.slane %v670_v12, %v2723_v61  ;;  %v693_v28 = vmul.f32 0.0078125, %v685_v20  ;;  %v553_v32 = vpop.xlane.xlu1 %552  ;;  %v688_v57 = vmul.f32 %v680_v46, %v551_v48  ;;  %v1825_v46 = vld [vmem:[%s3011_s6] ss:$0 sm:$0xff] }
 0x20d   : > { %v671_v17 = vmul.f32 0.0078125, %v663_v8  ;;  %v657_v18 = vmul.f32 %v2060_v63, %v649_v60  ;;  %v681_v39 = vmul.f32 %v649_v60, %v649_v60  ;;  %v986_v40 = vsel %vm720_vm1, %v985_v2, %v981_v9 }
 0x20e   : > { %v672_v33 = vmul.f32 0.0078125, %v664_v13  ;;  %v695_v51 = vmul.f32 0.0078125, %v687_v24  ;;  %v977_v55 = vsel %vm720_vm1, %v976_v7, %v972_v21  ;;  %v692_v53 = vmul.f32 0.0078125, %v684_v26  ;;  %v1288_v21 = vld [vmem:[#allocation10 + $0x18] sm:$0xff] }
 0x20f   : > { %v994_v27 = vrot.slane %v671_v17, %v2718_v56  ;;  %v665_v34 = vmul.f32 %v657_v18, %v2825_v38  ;;  %v689_v59 = vmul.f32 %v681_v39, %v553_v32  ;;  %v1005_v63 = vsel %vm749_vm2, %v986_v40, %v977_v55  ;;  %v1828_v39 = vld [vmem:[%s3011_s6 + $0x1] ss:$0 sm:$0xff] }
 0x210   : > { %v999_v38 = vrot.slane %v672_v33, %v2723_v61  ;;  %v694_v0 = vmul.f32 0.0078125, %v686_v45  ;;  %v1108_v58 = vrot.slane %v693_v28, %v2718_v56  ;;  %v696_v8 = vmul.f32 0.0078125, %v688_v57  ;;  %v1369_v33 = vld [vmem:[#allocation10 + $0x28] sm:$0xff] }
 0x211   : > { %v673_v25 = vmul.f32 0.0078125, %v665_v34  ;;  %v995_v50 = vsel %vm720_vm1, %v994_v27, %v990_v19  ;;  %v697_v36 = vmul.f32 0.0078125, %v689_v59  ;;  %v1117_v1 = vrot.slane %v695_v51, %v2718_v56  ;;  %v1368_v27 = vld [vmem:[#allocation10 + $0x20] sm:$0xff] }
 0x212   : > { %v1006_v60 = vsel %vm751_vm3, %v995_v50, %v1005_v63  ;;  %v1099_v10 = vrot.slane %v691_v47, %v2718_v56  ;;  %v1104_v12 = vrot.slane %v692_v53, %v2723_v61  ;;  %v1113_v62 = vrot.slane %v694_v0, %v2723_v61 }
 0x213   : > { %v1003_v41 = vrot.slane %v673_v25, %v2718_v56  ;;  %v1126_v13 = vrot.slane %v697_v36, %v2718_v56  ;;  %v1095_v15 = vrot.slane %v690_v49, %v2723_v61  ;;  %v1122_v2 = vrot.slane %v696_v8, %v2723_v61  ;;  %v1821_v61 = vld [vmem:[%s3009_s4] ss:$0 sm:$0xff] }
 0x214   : > { %v1109_v16 = vsel %vm720_vm1, %v1108_v58, %v1104_v12  ;;  %v1118_v17 = vsel %vm720_vm1, %v1117_v1, %v1113_v62  ;;  %v1936_v34 = vpack.c.bf16 %v1369_v33, %v1368_v27  ;;  %v1466_v58 = vsub.s32 0, %v2715_v52 }
 0x215   : > { %v1004_v3 = vsel %vm720_vm1, %v1003_v41, %v999_v38  ;;  %v1100_v56 = vsel %vm720_vm1, %v1099_v10, %v1095_v15  ;;  %v1127_v18 = vsel %vm720_vm1, %v1126_v13, %v1122_v2  ;;  %v1477_v12 = vsub.s32 1, %v2715_v52 }
 0x216   : > { %v1007_v11 = vsel %vm753_vm4, %v1004_v3, %v1006_v60  ;;  %v1128_v20 = vsel %vm749_vm2, %v1109_v16, %v1100_v56  ;;  %v1488_v13 = vsub.s32 2, %v2715_v52  ;;  %v1499_v16 = vsub.s32 3, %v2715_v52 }
 0x217   : > { %1887 = vmatmul.mubr.msk.f32.vlgmr.msra.gmra.mrb[0].mxu0 %vm755_vm5, %v1007_v11  ;;  %v1129_v35 = vsel %vm751_vm3, %v1118_v17, %v1128_v20 }
 0x218   : > { %1928 = vmatpush3.bf16.msra.mxu0 %v1927_v54  ;;  %1893 = vmatprep.mubr.msk.f32.mxu0 %vm2313_vm0, %v2314_v44  ;;  %v1130_v42 = vsel %vm753_vm4, %v1127_v18, %v1129_v35  ;;  %v1287_v54 = vld [vmem:[#allocation10 + $0x10] sm:$0xff] }
 0x219   : > { %v1933_v26 = vpack.c.bf16 %v1288_v21, %v1287_v54 }
 0x21f   : > { %1894 = vmatmul.mubr.msk.f32.vlgmr.msra.gmra.mrb[0].mxu0 %vm755_vm5, %v1130_v42 }
 0x2f2   : > { %v1199_v7 = vpop.f32.mrb[0].mxu0 }
 0x2f3   : > { %v1938_v24 = vadd.f32 %v1821_v61, %v1199_v7  ;;  %v1895_v9 = vpop.f32.mrb[1].mxu0 }
 0x2f5   : > { %1901 = vmatmul.mubr.msk.f32.vlgmr.msra.gmra.mrb[0].mxu1 %vm755_vm5, %v1938_v24 }
 0x2f6   : > { %1934 = vmatpush3.bf16.msra.mxu1 %v1933_v26  ;;  %1907 = vmatprep.mubr.msk.f32.mxu1 %vm2313_vm0, %v2314_v44 }
 0x2f7   : > { %1935 = vmatprep.subr.bf16.mxu1 %v2312_v43 }
 0x2f9   : > { %1908 = vmatmul.mubr.msk.f32.vlgmr.msra.gmra.mrb[2].mxu1 %vm755_vm5, %v1938_v24 }
 0x2fa   : > { %1937 = vmatpush3.bf16.msra.mxu1 %v1936_v34  ;;  %1914 = vmatprep.mubr.msk.f32.mxu1 %vm2313_vm0, %v2314_v44  ;;  %v1831_v44 = vld [vmem:[%s3011_s6 + $0x2] ss:$0 sm:$0xff] }
 0x2fd   : > { %1915 = vmatmul.mubr.msk.f32.vlgmr.msra.gmra.mrb[4].mxu1 %vm755_vm5, %v1938_v24 }
 0x3c8   : > { %v1282_v19 = vpop.f32.mrb[0].mxu1 }
 0x3c9   : > { %v1902_v45 = vpop.f32.mrb[1].mxu1  ;;  %v1283_v43 = vadd.f32 %v1825_v46, %v1282_v19 }
 0x3cc   : > { %v1363_v40 = vpop.f32.mrb[2].mxu1 }
 0x3cd   : > { %v1364_v25 = vadd.f32 %v1828_v39, %v1363_v40  ;;  %v1909_v47 = vpop.f32.mrb[3].mxu1 }
 0x3cf   : > { %v1448_v28 = vmax.f32 %v1283_v43, %v1364_v25 }
 0x3d0   : > { %v1444_v48 = vpop.f32.mrb[4].mxu1 }
 0x3d1   : > { %v1445_v32 = vadd.f32 %v1831_v44, %v1444_v48  ;;  %v1916_v50 = vpop.f32.mrb[5].mxu1  ;;  %v2069_v48 = vld [vmem:[%s2629_s22 + $0x10] sm:$0xff] }
 0x3d3   : > { %v1449_v51 = vmax.f32 %v1448_v28, %v1445_v32 }
 0x3d5   : > { %v1450_v57 = vsub.f32 %v1283_v43, %v1449_v51  ;;  %v1453_v59 = vsub.f32 %v1364_v25, %v1449_v51  ;;  %v1456_v55 = vsub.f32 %v1445_v32, %v1449_v51  ;;  %v2070_v51 = vld [vmem:[%s2621_s27 + $0x10] sm:$0xff] }
 0x3d7   : > { %v1451_v38 = vmul.f32 1.442695, %v1450_v57  ;;  %v1454_v41 = vmul.f32 1.442695, %v1453_v59  ;;  %v1457_v53 = vmul.f32 1.442695, %v1456_v55 }
 0x3d9   : > { %2061 = vpow2.f32 %v1451_v38 }
 0x3da   : > { %2063 = vpow2.f32 %v1454_v41 }
 0x3db   : > { %2065 = vpow2.f32 %v1457_v53  ;;  %v2071_v53 = vld [vmem:[%s2636_s29 + $0x10] sm:$0xff] }
 0x3e3   : > { %v2062_v63 = vpop.eup %2061 }
 0x3e4   : > { %v2064_v49 = vpop.eup %2063 }
 0x3e5   : > { %v1459_v0 = vadd.f32 %v2064_v49, %v2062_v63  ;;  %v2066_v36 = vpop.eup %2065 }
 0x3e7   : > { %v1460_v3 = vadd.f32 %v2066_v36, %v1459_v0 }
 0x3e9   : > { %2067 = vrcp.f32 %v1460_v3  ;;  %v2073_v3 = vld [vmem:[%s2629_s22 + $0x18] sm:$0xff] }
 0x3f3   : > { %v2068_v8 = vpop.eup %2067 }
 0x3f4   : > { %v1463_v60 = vmul.f32 %v2068_v8, %v2062_v63  ;;  %v1516_v1 = vmul.f32 %v2068_v8, %v2064_v49  ;;  %v1577_v11 = vmul.f32 %v2068_v8, %v2066_v36 }
 0x3f6   : > { %v1467_v10 = vrot.slane %v1463_v60, %v1466_v58  ;;  %v1478_v62 = vrot.slane %v1463_v60, %v1477_v12  ;;  %v1489_v15 = vrot.slane %v1463_v60, %v1488_v13  ;;  %v1500_v2 = vrot.slane %v1463_v60, %v1499_v16 }
 0x3f7   : > { %v1520_v17 = vrot.slane %v1516_v1, %v1466_v58  ;;  %v1531_v56 = vrot.slane %v1516_v1, %v1477_v12  ;;  %v1542_v18 = vrot.slane %v1516_v1, %v1488_v13  ;;  %v1553_v20 = vrot.slane %v1516_v1, %v1499_v16 }
 0x3f8   : > { %1473 = vbcast.lane.b32.xlu1 %v1467_v10, 264  ;;  %1469 = vbcast.lane.b32.xlu0 %v1467_v10, 256  ;;  %v1581_v35 = vrot.slane %v1577_v11, %v1466_v58  ;;  %v1592_v52 = vrot.slane %v1577_v11, %v1477_v12  ;;  %v1603_v42 = vrot.slane %v1577_v11, %v1488_v13  ;;  %v2075_v13 = vld [vmem:[%s2621_s27 + $0x18] sm:$0xff] }
 0x3f9   : > { %v1614_v54 = vrot.slane %v1577_v11, %v1499_v16  ;;  %v2074_v11 = vld [vmem:[%s2636_s29 + $0x8] sm:$0xff] }
 0x3fc   : > { %1480 = vbcast.lane.b32.xlu1 %v1478_v62, 256  ;;  %1491 = vbcast.lane.b32.xlu0 %v1489_v15, 256 }
 0x400   : > { %1484 = vbcast.lane.b32.xlu1 %v1478_v62, 264  ;;  %1502 = vbcast.lane.b32.xlu0 %v1500_v2, 256 }
 0x404   : > { %1495 = vbcast.lane.b32.xlu1 %v1489_v15, 264  ;;  %1522 = vbcast.lane.b32.xlu0 %v1520_v17, 256 }
 0x408   : > { %1506 = vbcast.lane.b32.xlu1 %v1500_v2, 264  ;;  %1533 = vbcast.lane.b32.xlu0 %v1531_v56, 256 }
 0x40c   : > { %1526 = vbcast.lane.b32.xlu1 %v1520_v17, 264  ;;  %1544 = vbcast.lane.b32.xlu0 %v1542_v18, 256 }
 0x410   : > { %1537 = vbcast.lane.b32.xlu1 %v1531_v56, 264  ;;  %1555 = vbcast.lane.b32.xlu0 %v1553_v20, 256 }
 0x414   : > { %1548 = vbcast.lane.b32.xlu1 %v1542_v18, 264  ;;  %1583 = vbcast.lane.b32.xlu0 %v1581_v35, 256  ;;  %v2076_v18 = vld [vmem:[%s2629_s22 + $0x28] sm:$0xff] }
 0x418   : > { %1559 = vbcast.lane.b32.xlu1 %v1553_v20, 264  ;;  %1594 = vbcast.lane.b32.xlu0 %v1592_v52, 256 }
 0x41c   : > { %1587 = vbcast.lane.b32.xlu1 %v1581_v35, 264  ;;  %1605 = vbcast.lane.b32.xlu0 %v1603_v42, 256 }
 0x420   : > { %1598 = vbcast.lane.b32.xlu1 %v1592_v52, 264  ;;  %1616 = vbcast.lane.b32.xlu0 %v1614_v54, 256  ;;  %v2078_v52 = vld [vmem:[%s2621_s27 + $0x28] sm:$0xff] }
 0x424   : > { %1609 = vbcast.lane.b32.xlu1 %v1603_v42, 264 }
 0x428   : > { %1620 = vbcast.lane.b32.xlu1 %v1614_v54, 264 }
 0x46a   : > { %v1474_v21 = vpop.permute.xlu1 %1473  ;;  %v1470_v61 = vpop.permute.xlu0 %1469 }
 0x46b   : > { %v1508_v25 = vmul.f32 %v1470_v61, %v2646_v4 }
 0x46e   : > { %v1481_v7 = vpop.permute.xlu1 %1480  ;;  %v1492_v26 = vpop.permute.xlu0 %1491 }
 0x46f   : > { %v1510_v57 = vmul.f32 %v2070_v51, %v1481_v7  ;;  %v1512_v0 = vmul.f32 %v1492_v26, %v2671_v22  ;;  %v2079_v26 = vld [vmem:[%s2629_s22 + $0x38] sm:$0xff] }
 0x472   : > { %v1485_v24 = vpop.permute.xlu1 %1484  ;;  %v1503_v9 = vpop.permute.xlu0 %1502 }
 0x473   : > { %v1511_v22 = vmul.f32 %v2075_v13, %v1485_v24  ;;  %v1514_v62 = vmul.f32 %v1503_v9, %v2685_v30  ;;  %v2080_v9 = vld [vmem:[%s2636_s29 + $0x28] sm:$0xff] }
 0x476   : > { %v1496_v27 = vpop.permute.xlu1 %1495  ;;  %v1523_v33 = vpop.permute.xlu0 %1522 }
 0x477   : > { %v1561_v43 = vmul.f32 %v1523_v33, %v2649_v5  ;;  %v1513_v42 = vmul.f32 %v2078_v52, %v1496_v27 }
 0x479   : > { %v1569_v28 = vadd.f32 %v1561_v43, %v1508_v25 }
 0x47a   : > { %v2916_v34 = vpop.permute.xlu1 %1506  ;;  %v1534_v19 = vpop.permute.xlu0 %1533 }
 0x47b   : > { %v1563_v32 = vmul.f32 %v2069_v48, %v1534_v19  ;;  %v2081_v19 = vld [vmem:[%s2621_s27 + $0x38] sm:$0xff] }
 0x47d   : > { %v1571_v41 = vadd.f32 %v1563_v32, %v1510_v57 }
 0x47e   : > { %v1527_v45 = vpop.permute.xlu1 %1526  ;;  %v1545_v46 = vpop.permute.xlu0 %1544 }
 0x47f   : > { %v1562_v55 = vmul.f32 %v1527_v45, %v2661_v14  ;;  %v1565_v4 = vmul.f32 %v1545_v46, %v2674_v23 }
 0x481   : > { %v1573_v23 = vadd.f32 %v1565_v4, %v1512_v0 }
 0x482   : > { %v1538_v39 = vpop.permute.xlu1 %1537  ;;  %v1556_v40 = vpop.permute.xlu0 %1555 }
 0x483   : > { %v1564_v58 = vmul.f32 %v2073_v3, %v1538_v39  ;;  %v1567_v1 = vmul.f32 %v1556_v40, %v2688_v31  ;;  %v2082_v39 = vld [vmem:[%s2636_s29 + $0x38] sm:$0xff] }
 0x485   : > { %v1572_v2 = vadd.f32 %v1564_v58, %v1511_v22  ;;  %v1575_v31 = vadd.f32 %v1567_v1, %v1514_v62 }
 0x486   : > { %v1549_v47 = vpop.permute.xlu1 %1548  ;;  %v1584_v44 = vpop.permute.xlu0 %1583 }
 0x487   : > { %v1622_v50 = vmul.f32 %v1584_v44, %v2652_v6  ;;  %v2072_v6 = vld [vmem:[%s2621_s27 + $0x8] sm:$0xff]  ;;  %v1566_v20 = vmul.f32 %v2076_v18, %v1549_v47  ;;  %s2229_s27 = scalar_lea.vmem %s2953_s20, 1024 }
 0x488   : > { %v1509_v49 = vmul.f32 %v2072_v6, %v1474_v21  ;;  %p2230_p3 = scmp.ne.s32.totalorder %s2953_s20, %s2229_s27  ;;  %p2237_p9 = scmp.lt.s32.totalorder %s2235_s11, %s2229_s27 }
 0x489   : > { %v1630_v59 = vadd.f32 %v1622_v50, %v1569_v28  ;;  %v1574_v7 = vadd.f32 %v1566_v20, %v1513_v42 }
 0x48a   : > { %v1560_v38 = vpop.permute.xlu1 %1559  ;;  %v1595_v5 = vpop.permute.xlu0 %1594  ;;  %v1570_v14 = vadd.f32 %v1562_v55, %v1509_v49  ;;  %p2231_p0 = pnand %p2230_p3, %p3065_p7  ;;  %p2238_p10 = por %p2237_p9, %p2236_p2 }
 0x48b   : > { %1638 = vst [vmem:[%s2926_s19] sm:$0xff] %v1630_v59  ;;  %v1624_v63 = vmul.f32 %v2071_v53, %v1595_v5  ;;  %v1568_v24 = vmul.f32 %v2079_v26, %v1560_v38 }
 0x48c   : > { %p2232_p6 = pneg %p2231_p0 }
 0x48d   : > { %v1632_v36 = vadd.f32 %v1624_v63, %v1571_v41 }
 0x48e   : > { %v1588_v8 = vpop.permute.xlu1 %1587  ;;  %v1606_v60 = vpop.permute.xlu0 %1605  ;;  %p2239_p1 = pnand %p2238_p10, %p2232_p6 }
 0x48f   : > { %1640 = vst [vmem:[%s2926_s19 + $0x10] sm:$0xff] %v1632_v36  ;;  %v1623_v10 = vmul.f32 %v2074_v11, %v1588_v8  ;;  %v1626_v12 = vmul.f32 %v1606_v60, %v2682_v29  ;;  %v2077_v29 = vld [vmem:[%s2636_s29 + $0x18] sm:$0xff] }
 0x491   : > { %v1631_v15 = vadd.f32 %v1623_v10, %v1570_v14  ;;  %v1634_v16 = vadd.f32 %v1626_v12, %v1573_v23 }
 0x492   : > { %v1599_v17 = vpop.permute.xlu1 %1598  ;;  %v1617_v56 = vpop.permute.xlu0 %1616 }
 0x493   : > { %1639 = vst [vmem:[%s2926_s19 + $0x8] sm:$0xff] %v1631_v15  ;;  %1642 = vst [vmem:[%s2926_s19 + $0x20] sm:$0xff] %v1634_v16  ;;  %v1625_v35 = vmul.f32 %v2077_v29, %v1599_v17  ;;  %v1628_v30 = vmul.f32 %v1617_v56, %v2698_v37  ;;  %v1515_v37 = vmul.f32 %v2081_v19, %v2916_v34 }
 0x495   : > { %v1633_v54 = vadd.f32 %v1625_v35, %v1572_v2  ;;  %v1636_v21 = vadd.f32 %v1628_v30, %v1575_v31  ;;  %v1576_v46 = vadd.f32 %v1568_v24, %v1515_v37 }
 0x496   : > { %v1610_v61 = vpop.permute.xlu1 %1609 }
 0x497   : > { %1641 = vst [vmem:[%s2926_s19 + $0x18] sm:$0xff] %v1633_v54  ;;  %1644 = vst [vmem:[%s2926_s19 + $0x30] sm:$0xff] %v1636_v21  ;;  %v1627_v33 = vmul.f32 %v2080_v9, %v1610_v61 }
 0x499   : > { %v1635_v27 = vadd.f32 %v1627_v33, %v1574_v7 }
 0x49a   : > { %v1621_v45 = vpop.permute.xlu1 %1620 }
 0x49b   : > { %1643 = vst [vmem:[%s2926_s19 + $0x28] sm:$0xff] %v1635_v27  ;;  %v1629_v40 = vmul.f32 %v2082_v39, %v1621_v45 }
 0x49d   : > { %v1637_v43 = vadd.f32 %v1629_v40, %v1576_v46 }
 0x49f   : > { %1645 = vst [vmem:[%s2926_s19 + $0x38] sm:$0xff] %v1637_v43 }
 0x4a0   : > { %2242 = shalt.err (!%p2239_p1)
}
 0x4a1   : > { %s2243_s22 = scalar_lea.hbm %s2960_s30, 1024  ;;  %s2247_s24 = scalar_lea.hbm %s3012_s7, 2048 }
 0x4a2   : > { %p2244_p5 = scmp.ne.s32.totalorder %s2960_s30, %s2243_s22  ;;  %p2248_p4 = scmp.lt.u32.totalorder %s2960_s30, %s3012_s7 }
 0x4a3   : > { %p2249_p8 = scmp.lt.u32.totalorder %s2247_s24, %s2243_s22  ;;  %p2251_p3 = scmp.lt.u32.totalorder %s2243_s22, %s2960_s30 }
 0x4a4   : > { %p2245_p11 = pnand %p2244_p5, %p3065_p7 }
 0x4a5   : > { %p2250_p13 = por %p2249_p8, %p2248_p4 }
 0x4a6   : > { %p2246_p12 = pneg %p2245_p11 }
 0x4a7   : > { %p2252_p0 = por %p2251_p3, %p2250_p13 }
 0x4a9   : > { %p2253_p6 = pnand %p2252_p0, %p2246_p12 }
 0x4ab   : > { %2256 = shalt.err (!%p2253_p6)
}
 0x4ac   : > { %s2316_s18 = smov 128   ;;  %s2317_s17 = smov 8  }
 0x4ad   : > { %1959 = dma.vmem_to_hbm [thread:$0]  (%p3065_p7), %s2953_s20, 1024, %s2960_s30, %s1647_s8, %s2316_s18, %s2316_s18, %s2317_s17  }
 0x4ae PF: > { %s3066_s10 = sld [smem:[#allocation16_spill]]  ;;  %s3067_s16 = sld [smem:[#allocation20_spill]] }
 0x4af   : > { %s3068_s19 = sld [smem:[#allocation17_spill]] }
 0x4b4   : > { %s1676_s9 = sand.u32 1, %s3066_s10   ;;  %p3069_p2 = scmp.ne.s32.totalorder %s3067_s16, 0 }
 0x4b5   : > { %p3070_p9 = scmp.ge.s32.totalorder %s3068_s19, 2  ;;  %s1677_s1 = scalar_lea.sflag [#allocation4], %s1676_s9 }
 0x4b7   : > { %p1979_p10 = pnand %p3070_p9, %p3069_p2 }
 0x4b9   : > { %2286 = dma.done.wait (!%p1979_p10), %s1677_s1, 1024  }
 0x4ba   : > { %2288 = vsyncadd (!%p1979_p10), %s1677_s1, 4294966272  ;;  %s3071_s27 = sld [smem:[#allocation18_spill]]  ;;  %s3072_s3 = sld [smem:[#allocation19_spill]] }
 0x4bb   : > { %s3073_s24 = smov %s2295_s25  ;;  %s3074_s25 = smov %s2299_s26 }
 0x4c0   : > { %p24_p1 = scmp.ge.s32.totalorder %s3071_s27, 4   ;;  %s3075_s26 = smov %s3072_s3 }
 0x4c2   :  { %26 = sbr.rel (!%p24_p1) target bundleno = 11 (0xb), region = 132 }
 0x4c9   :  { %1682 = vsyncpa [#allocation3], 1 }
 0x4ca   :  { %1684 = vsyncpa [#allocation3 + $0x1], 1 }
 0x4cb   :  { %1685 = vsyncpa [#allocation6], 1 }
 0x4cc   :  { %1687 = vsyncpa [#allocation6 + $0x1], 1 }
 0x4cd   :  { %1688 = vsyncpa [#allocation9], 1 }
 0x4ce   :  { %1689 = vsyncpa [#allocation4], 1 }
 0x4cf   :  { %1691 = vsyncpa [#allocation4 + $0x1], 1 }

</bundles_post_ra>
